<compile_context>
chip_gen: v6e
topology: v6e:2x2x1
jax: 0.10.0
libtpu: 0.0.40
codegen_flags: <defaults>
</compile_context>

<pallas_src>
import jax
import jax.numpy as jnp
from jax import lax
from jax.experimental import pallas as pl
from jax.experimental.pallas import tpu as pltpu


def lstm_encoder_kernel(x_ref, wp_ref, bp_ref, wih_ref, whh_ref, b_ref,
                        h0_ref, c0_ref,
                        out_ref, hn_ref, cn_ref,
                        xg_s):
    """Whole forward pass in one invocation (grid=(1,)).

    x_ref   : (T*BP, Din) f32   time-major input, batch padded to BP=8 rows
    wp_ref  : (Din, H)    f32   input_proj.weight^T
    bp_ref  : (1, H)      f32   input_proj.bias
    wih_ref : (H, 4H)     bf16  LSTM weight_ih^T, gate cols (i, f, o, g)
    whh_ref : (H, 4H)     bf16  LSTM weight_hh^T, gate cols (i, f, o, g)
    b_ref   : (1, 4H)     f32   b_ih + b_hh, gate cols (i, f, o, g)
    h0/c0   : (BP, H)     f32   initial hidden / cell state (padded rows = 0)
    out_ref : (T, BP, H)  f32   all hidden states, time-major, padded batch
    hn/cn   : (BP, H)     f32   final hidden / cell state
    xg_s    : (T*BP, 4H)  f32   VMEM scratch: batched input-gate pre-activations
    """
    TB = x_ref.shape[0]
    H = whh_ref.shape[0]
    BP = h0_ref.shape[0]           # = 8 (one full sublane tile)
    T = TB // BP

    # ---- batched input path (all timesteps at once): proj -> ReLU -> W_ih ----
    # Tiny (TB, Din) x (Din, H) projection kept in f32 for accuracy; the wide
    # (TB, H) x (H, 4H) gate matmul uses bf16 operands with f32 accumulation.
    xp = jnp.maximum(
        jnp.dot(x_ref[...], wp_ref[...], preferred_element_type=jnp.float32)
        + bp_ref[...], 0.0)                                          # (TB, H)
    xg_s[...] = (jnp.dot(xp.astype(jnp.bfloat16), wih_ref[...],
                         preferred_element_type=jnp.float32)
                 + b_ref[...])                                       # (TB, 4H)

    # ---- sequential LSTM recurrence; h/c live in vregs as loop carries ----
    def step(t, carry):
        h, c = carry
        start = pl.multiple_of(t * BP, BP)                 # tile-aligned read
        xg_t = xg_s[pl.ds(start, BP), :]                   # (BP, 4H)
        gates = xg_t + jnp.dot(h.astype(jnp.bfloat16), whh_ref[...],
                               preferred_element_type=jnp.float32)   # (BP, 4H)
        # Gate column order (after wrapper permutation): i, f, o, g.
        # One wide sigmoid + one tanh -> 2 EUP launches per step.
        sig = jax.nn.sigmoid(gates[:, 0:3 * H])
        g_g = jnp.tanh(gates[:, 3 * H:4 * H])
        i_g = sig[:, 0:H]
        f_g = sig[:, H:2 * H]
        o_g = sig[:, 2 * H:3 * H]
        c_new = f_g * c + i_g * g_g
        h_new = o_g * jnp.tanh(c_new)
        out_ref[t] = h_new                                 # dense (8,128) store
        return (h_new, c_new)

    # v7x guard: (T*BP, 4H) f32 scratch is 16 KiB per timestep and the loop is
    # fully unrolled -- fine at T=8; chunk the input path / cap the unroll for
    # long sequences (v7x has only 64 MiB VMEM).
    h_fin, c_fin = lax.fori_loop(0, T, step, (h0_ref[...], c0_ref[...]),
                                 unroll=True)
    hn_ref[...] = h_fin
    cn_ref[...] = c_fin


def lstm_encoder_forward(x, params, hidden=None):
    """Pallas implementation of LSTMEncoder.forward.

    x: (B, T, in_dim).  Returns (output (B, T, H), (h_n (1,B,H), c_n (1,B,H))).
    """
    B, T, Din = x.shape
    H = params["w_hh"].shape[1]
    BP = ((B + 7) // 8) * 8          # pad batch to a full 8-sublane tile

    # ---- plain-JAX glue: layout plumbing + parameter packing only ----------
    # Permute PyTorch gate blocks (i, f, g, o) -> (i, f, o, g) once (zero
    # runtime cost) so sigmoid covers one contiguous slice in the kernel.
    def permute_gates(w):
        return (w.reshape(4, H, *w.shape[1:])[jnp.array([0, 1, 3, 2])]
                .reshape(w.shape))

    w_ih_p = permute_gates(params["w_ih"])                  # (4H, H)
    w_hh_p = permute_gates(params["w_hh"])                  # (4H, H)
    b_p = permute_gates(params["b_ih"] + params["b_hh"])    # (4H,)

    wp_t = params["wp"].T.astype(jnp.float32)               # (Din, H)
    bp = params["bp"][None, :].astype(jnp.float32)          # (1, H)
    wih_t = w_ih_p.T.astype(jnp.bfloat16)                   # (H, 4H) bf16
    whh_t = w_hh_p.T.astype(jnp.bfloat16)                   # (H, 4H) bf16
    b = b_p[None, :].astype(jnp.float32)                    # (1, 4H)

    x_tm = jnp.transpose(x, (1, 0, 2))                      # (T, B, Din)
    x_tm = jnp.pad(x_tm, ((0, 0), (0, BP - B), (0, 0)))     # (T, BP, Din)
    x_tm = x_tm.reshape(T * BP, Din).astype(jnp.float32)

    if hidden is None:
        h0 = jnp.zeros((BP, H), jnp.float32)
        c0 = jnp.zeros((BP, H), jnp.float32)
    else:
        h0 = jnp.pad(hidden[0].reshape(B, H), ((0, BP - B), (0, 0)))
        c0 = jnp.pad(hidden[1].reshape(B, H), ((0, BP - B), (0, 0)))

    out_tm, h_n, c_n = pl.pallas_call(
        lstm_encoder_kernel,
        out_shape=(
            jax.ShapeDtypeStruct((T, BP, H), jnp.float32),
            jax.ShapeDtypeStruct((BP, H), jnp.float32),
            jax.ShapeDtypeStruct((BP, H), jnp.float32),
        ),
        grid_spec=pltpu.PrefetchScalarGridSpec(
            num_scalar_prefetch=0,
            grid=(1,),
            in_specs=[
                pl.BlockSpec((T * BP, Din), lambda i: (0, 0)),
                pl.BlockSpec((Din, H), lambda i: (0, 0)),
                pl.BlockSpec((1, H), lambda i: (0, 0)),
                pl.BlockSpec((H, 4 * H), lambda i: (0, 0)),
                pl.BlockSpec((H, 4 * H), lambda i: (0, 0)),
                pl.BlockSpec((1, 4 * H), lambda i: (0, 0)),
                pl.BlockSpec((BP, H), lambda i: (0, 0)),
                pl.BlockSpec((BP, H), lambda i: (0, 0)),
            ],
            out_specs=[
                pl.BlockSpec((T, BP, H), lambda i: (0, 0, 0)),
                pl.BlockSpec((BP, H), lambda i: (0, 0)),
                pl.BlockSpec((BP, H), lambda i: (0, 0)),
            ],
            scratch_shapes=[pltpu.VMEM((T * BP, 4 * H), jnp.float32)],
        ),
        compiler_params=pltpu.CompilerParams(
            dimension_semantics=("arbitrary",)),
    )(x_tm, wp_t, bp, wih_t, whh_t, b, h0, c0)

    output = jnp.transpose(out_tm[:, :B, :], (1, 0, 2))     # (B, T, H)
    return output, (h_n[None, :B, :], c_n[None, :B, :])


def lstm_encoder_ref(x, params, hidden=None):
    """Pure-JAX f32 reference matching torch Linear + ReLU + nn.LSTM semantics."""
    B, T, _ = x.shape
    H = params["w_hh"].shape[1]
    xp = jnp.maximum(x @ params["wp"].T + params["bp"], 0.0)          # (B,T,H)
    b = params["b_ih"] + params["b_hh"]
    if hidden is None:
        h0 = jnp.zeros((B, H), jnp.float32)
        c0 = jnp.zeros((B, H), jnp.float32)
    else:
        h0, c0 = hidden[0][0], hidden[1][0]

    def step(carry, x_t):
        h, c = carry
        gates = x_t @ params["w_ih"].T + h @ params["w_hh"].T + b
        i = jax.nn.sigmoid(gates[:, :H])
        f = jax.nn.sigmoid(gates[:, H:2 * H])
        g = jnp.tanh(gates[:, 2 * H:3 * H])
        o = jax.nn.sigmoid(gates[:, 3 * H:])
        c = f * c + i * g
        h = o * jnp.tanh(c)
        return (h, c), h

    (h_n, c_n), hs = lax.scan(step, (h0, c0), jnp.transpose(xp, (1, 0, 2)))
    return jnp.transpose(hs, (1, 0, 2)), (h_n[None], c_n[None])


def init_params(key, in_dim, hidden_dim):
    """Deterministic synthetic weights with the same shapes as the PyTorch module."""
    H = hidden_dim
    ks = jax.random.split(key, 6)
    s = 0.1
    return {
        "wp":   s * jax.random.normal(ks[0], (H, in_dim), jnp.float32),
        "bp":   s * jax.random.normal(ks[1], (H,), jnp.float32),
        "w_ih": s * jax.random.normal(ks[2], (4 * H, H), jnp.float32),
        "w_hh": s * jax.random.normal(ks[3], (4 * H, H), jnp.float32),
        "b_ih": s * jax.random.normal(ks[4], (4 * H,), jnp.float32),
        "b_hh": s * jax.random.normal(ks[5], (4 * H,), jnp.float32),
    }


if __name__ == "__main__":
    B, T, IN_DIM, H = 2, 8, 8, 128   # module defaults: in_dim=8, hidden_dim=128

    key = jax.random.PRNGKey(0)
    kp, kx = jax.random.split(key, 2)
    params = init_params(kp, IN_DIM, H)
    x = jax.random.normal(kx, (B, T, IN_DIM), jnp.float32)

    fwd = jax.jit(lstm_encoder_forward)
    out, (h_n, c_n) = fwd(x, params)
    out = jax.block_until_ready(out)

    ref_out, (ref_h, ref_c) = lstm_encoder_ref(x, params)
    assert out.shape == (B, T, H), out.shape
    assert h_n.shape == (1, B, H) and c_n.shape == (1, B, H)
    # Tolerance widened vs. the pure-f32 version: MXU operands are bf16 (per
    # perf review) and LSTM state error compounds over T steps; elementwise
    # math is still f32 so the drift stays well below 2e-2.
    assert jnp.allclose(out, ref_out, atol=2e-2, rtol=2e-2), (
        f"max abs err (output) = {jnp.max(jnp.abs(out - ref_out))}")
    assert jnp.allclose(h_n, ref_h, atol=2e-2, rtol=2e-2), (
        f"max abs err (h_n) = {jnp.max(jnp.abs(h_n - ref_h))}")
    assert jnp.allclose(c_n, ref_c, atol=2e-2, rtol=2e-2), (
        f"max abs err (c_n) = {jnp.max(jnp.abs(c_n - ref_c))}")

    print("KERNEL_OK")
</pallas_src>

<mosaic_0001>
module attributes {stable_mosaic.version = 11 : i64} {
  func.func @lstm_encoder_kernel(%arg0: i32, %arg1: memref<64x8xf32, #tpu.memory_space<vmem>>, %arg2: memref<8x128xf32, #tpu.memory_space<vmem>>, %arg3: memref<1x128xf32, #tpu.memory_space<vmem>>, %arg4: memref<128x512xbf16, #tpu.memory_space<vmem>>, %arg5: memref<128x512xbf16, #tpu.memory_space<vmem>>, %arg6: memref<1x512xf32, #tpu.memory_space<vmem>>, %arg7: memref<8x128xf32, #tpu.memory_space<vmem>>, %arg8: memref<8x128xf32, #tpu.memory_space<vmem>>, %arg9: memref<8x8x128xf32, #tpu.memory_space<vmem>>, %arg10: memref<8x128xf32, #tpu.memory_space<vmem>>, %arg11: memref<8x128xf32, #tpu.memory_space<vmem>>, %arg12: memref<64x512xf32, #tpu.memory_space<vmem>>) attributes {dimension_semantics = [#tpu.dimension_semantics<arbitrary>], iteration_bounds = array<i64: 1>, scalar_prefetch = 0 : i64, scratch_operands = 1 : i64, tpu.core_type = #tpu.core_type<tc>, window_params = [{pipeline_mode = #tpu.pipeline_mode<synchronous>, transform_indices = @transform_0, window_bounds = array<i64: 64, 8>}, {pipeline_mode = #tpu.pipeline_mode<synchronous>, transform_indices = @transform_1, window_bounds = array<i64: 8, 128>}, {pipeline_mode = #tpu.pipeline_mode<synchronous>, transform_indices = @transform_2, window_bounds = array<i64: 1, 128>}, {pipeline_mode = #tpu.pipeline_mode<synchronous>, transform_indices = @transform_3, window_bounds = array<i64: 128, 512>}, {pipeline_mode = #tpu.pipeline_mode<synchronous>, transform_indices = @transform_4, window_bounds = array<i64: 128, 512>}, {pipeline_mode = #tpu.pipeline_mode<synchronous>, transform_indices = @transform_5, window_bounds = array<i64: 1, 512>}, {pipeline_mode = #tpu.pipeline_mode<synchronous>, transform_indices = @transform_6, window_bounds = array<i64: 8, 128>}, {pipeline_mode = #tpu.pipeline_mode<synchronous>, transform_indices = @transform_7, window_bounds = array<i64: 8, 128>}, {pipeline_mode = #tpu.pipeline_mode<synchronous>, transform_indices = @transform_8, window_bounds = array<i64: 8, 8, 128>}, {pipeline_mode = #tpu.pipeline_mode<synchronous>, transform_indices = @transform_9, window_bounds = array<i64: 8, 128>}, {pipeline_mode = #tpu.pipeline_mode<synchronous>, transform_indices = @transform_10, window_bounds = array<i64: 8, 128>}]} {
    %c0 = arith.constant 0 : index
    %c0_0 = arith.constant 0 : index
    %0 = vector.load %arg1[%c0, %c0_0] : memref<64x8xf32, #tpu.memory_space<vmem>>, vector<64x8xf32>
    %c0_1 = arith.constant 0 : index
    %c0_2 = arith.constant 0 : index
    %1 = vector.load %arg2[%c0_1, %c0_2] : memref<8x128xf32, #tpu.memory_space<vmem>>, vector<8x128xf32>
    %cst = arith.constant dense<0.000000e+00> : vector<64x128xf32>
    %2 = tpu.matmul %0, %1, %cst {dimension_numbers = #tpu.dot_dimension_numbers<[1], [0], [0], [1], [0, 0, 1, 1], [], []>} : vector<64x8xf32>, vector<8x128xf32>, vector<64x128xf32> -> vector<64x128xf32>
    %c0_3 = arith.constant 0 : index
    %c0_4 = arith.constant 0 : index
    %3 = vector.load %arg3[%c0_3, %c0_4] : memref<1x128xf32, #tpu.memory_space<vmem>>, vector<1x128xf32>
    %4 = vector.broadcast %3 : vector<1x128xf32> to vector<64x128xf32>
    %5 = arith.addf %2, %4 : vector<64x128xf32>
    %cst_5 = arith.constant 0.000000e+00 : f32
    %6 = vector.broadcast %cst_5 : f32 to vector<64x128xf32>
    %7 = arith.maximumf %5, %6 : vector<64x128xf32>
    %8 = arith.truncf %7 : vector<64x128xf32> to vector<64x128xbf16>
    %c0_6 = arith.constant 0 : index
    %c0_7 = arith.constant 0 : index
    %9 = vector.load %arg4[%c0_6, %c0_7] : memref<128x512xbf16, #tpu.memory_space<vmem>>, vector<128x512xbf16>
    %cst_8 = arith.constant dense<0.000000e+00> : vector<64x512xf32>
    %10 = tpu.matmul %8, %9, %cst_8 {dimension_numbers = #tpu.dot_dimension_numbers<[1], [0], [0], [1], [0, 0, 1, 1], [], []>} : vector<64x128xbf16>, vector<128x512xbf16>, vector<64x512xf32> -> vector<64x512xf32>
    %c0_9 = arith.constant 0 : index
    %c0_10 = arith.constant 0 : index
    %11 = vector.load %arg6[%c0_9, %c0_10] : memref<1x512xf32, #tpu.memory_space<vmem>>, vector<1x512xf32>
    %12 = vector.broadcast %11 : vector<1x512xf32> to vector<64x512xf32>
    %13 = arith.addf %10, %12 : vector<64x512xf32>
    %c0_11 = arith.constant 0 : index
    %c0_12 = arith.constant 0 : index
    %14 = vector.load %arg12[%c0_11, %c0_12] : memref<64x512xf32, #tpu.memory_space<vmem>>, vector<64x512xf32>
    tpu.vector_store %arg12[%c0_11, %c0_12], %13 {strides = array<i32>} : memref<64x512xf32, #tpu.memory_space<vmem>>, vector<64x512xf32>,
    %c0_13 = arith.constant 0 : index
    %c0_14 = arith.constant 0 : index
    %15 = vector.load %arg7[%c0_13, %c0_14] : memref<8x128xf32, #tpu.memory_space<vmem>>, vector<8x128xf32>
    %c0_15 = arith.constant 0 : index
    %c0_16 = arith.constant 0 : index
    %16 = vector.load %arg8[%c0_15, %c0_16] : memref<8x128xf32, #tpu.memory_space<vmem>>, vector<8x128xf32>
    %c0_i32 = arith.constant 0 : i32
    %c8_i32 = arith.constant 8 : i32
    %17 = arith.muli %c0_i32, %c8_i32 : i32
    %18 = tpu.assume_multiple %17, 8 : i32
    %19 = arith.index_cast %18 : i32 to index
    %c0_17 = arith.constant 0 : index
    %20 = vector.load %arg12[%19, %c0_17] : memref<64x512xf32, #tpu.memory_space<vmem>>, vector<8x512xf32>
    %21 = arith.truncf %15 : vector<8x128xf32> to vector<8x128xbf16>
    %c0_18 = arith.constant 0 : index
    %c0_19 = arith.constant 0 : index
    %22 = vector.load %arg5[%c0_18, %c0_19] : memref<128x512xbf16, #tpu.memory_space<vmem>>, vector<128x512xbf16>
    %cst_20 = arith.constant dense<0.000000e+00> : vector<8x512xf32>
    %23 = tpu.matmul %21, %22, %cst_20 {dimension_numbers = #tpu.dot_dimension_numbers<[1], [0], [0], [1], [0, 0, 1, 1], [], []>} : vector<8x128xbf16>, vector<128x512xbf16>, vector<8x512xf32> -> vector<8x512xf32>
    %24 = arith.addf %20, %23 : vector<8x512xf32>
    %25 = vector.extract_strided_slice %24 {offsets = [0, 0], sizes = [8, 384], strides = [1, 1]} : vector<8x512xf32> to vector<8x384xf32>
    %26 = arith.negf %25 : vector<8x384xf32>
    %27 = math.exp %26 : vector<8x384xf32>
    %cst_21 = arith.constant 1.000000e+00 : f32
    %28 = vector.broadcast %cst_21 : f32 to vector<8x384xf32>
    %29 = arith.addf %28, %27 : vector<8x384xf32>
    %30 = arith.divf %28, %29 : vector<8x384xf32>
    %31 = vector.extract_strided_slice %24 {offsets = [0, 384], sizes = [8, 128], strides = [1, 1]} : vector<8x512xf32> to vector<8x128xf32>
    %32 = math.tanh %31 : vector<8x128xf32>
    %33 = vector.extract_strided_slice %30 {offsets = [0, 0], sizes = [8, 128], strides = [1, 1]} : vector<8x384xf32> to vector<8x128xf32>
    %34 = vector.extract_strided_slice %30 {offsets = [0, 128], sizes = [8, 128], strides = [1, 1]} : vector<8x384xf32> to vector<8x128xf32>
    %35 = vector.extract_strided_slice %30 {offsets = [0, 256], sizes = [8, 128], strides = [1, 1]} : vector<8x384xf32> to vector<8x128xf32>
    %36 = arith.mulf %34, %16 : vector<8x128xf32>
    %37 = arith.mulf %33, %32 : vector<8x128xf32>
    %38 = arith.addf %36, %37 : vector<8x128xf32>
    %39 = math.tanh %38 : vector<8x128xf32>
    %40 = arith.mulf %35, %39 : vector<8x128xf32>
    %41 = arith.index_cast %c0_i32 : i32 to index
    %c0_22 = arith.constant 0 : index
    %c0_23 = arith.constant 0 : index
    %42 = vector.load %arg9[%41, %c0_22, %c0_23] : memref<8x8x128xf32, #tpu.memory_space<vmem>>, vector<1x8x128xf32>
    %43 = vector.shape_cast %42 : vector<1x8x128xf32> to vector<8x128xf32>
    %44 = vector.shape_cast %40 : vector<8x128xf32> to vector<1x8x128xf32>
    tpu.vector_store %arg9[%41, %c0_22, %c0_23], %44 {strides = array<i32>} : memref<8x8x128xf32, #tpu.memory_space<vmem>>, vector<1x8x128xf32>,
    %c1_i32 = arith.constant 1 : i32
    %c8_i32_24 = arith.constant 8 : i32
    %45 = arith.muli %c1_i32, %c8_i32_24 : i32
    %46 = tpu.assume_multiple %45, 8 : i32
    %47 = arith.index_cast %46 : i32 to index
    %c0_25 = arith.constant 0 : index
    %48 = vector.load %arg12[%47, %c0_25] : memref<64x512xf32, #tpu.memory_space<vmem>>, vector<8x512xf32>
    %49 = arith.truncf %40 : vector<8x128xf32> to vector<8x128xbf16>
    %c0_26 = arith.constant 0 : index
    %c0_27 = arith.constant 0 : index
    %50 = vector.load %arg5[%c0_26, %c0_27] : memref<128x512xbf16, #tpu.memory_space<vmem>>, vector<128x512xbf16>
    %cst_28 = arith.constant dense<0.000000e+00> : vector<8x512xf32>
    %51 = tpu.matmul %49, %50, %cst_28 {dimension_numbers = #tpu.dot_dimension_numbers<[1], [0], [0], [1], [0, 0, 1, 1], [], []>} : vector<8x128xbf16>, vector<128x512xbf16>, vector<8x512xf32> -> vector<8x512xf32>
    %52 = arith.addf %48, %51 : vector<8x512xf32>
    %53 = vector.extract_strided_slice %52 {offsets = [0, 0], sizes = [8, 384], strides = [1, 1]} : vector<8x512xf32> to vector<8x384xf32>
    %54 = arith.negf %53 : vector<8x384xf32>
    %55 = math.exp %54 : vector<8x384xf32>
    %cst_29 = arith.constant 1.000000e+00 : f32
    %56 = vector.broadcast %cst_29 : f32 to vector<8x384xf32>
    %57 = arith.addf %56, %55 : vector<8x384xf32>
    %58 = arith.divf %56, %57 : vector<8x384xf32>
    %59 = vector.extract_strided_slice %52 {offsets = [0, 384], sizes = [8, 128], strides = [1, 1]} : vector<8x512xf32> to vector<8x128xf32>
    %60 = math.tanh %59 : vector<8x128xf32>
    %61 = vector.extract_strided_slice %58 {offsets = [0, 0], sizes = [8, 128], strides = [1, 1]} : vector<8x384xf32> to vector<8x128xf32>
    %62 = vector.extract_strided_slice %58 {offsets = [0, 128], sizes = [8, 128], strides = [1, 1]} : vector<8x384xf32> to vector<8x128xf32>
    %63 = vector.extract_strided_slice %58 {offsets = [0, 256], sizes = [8, 128], strides = [1, 1]} : vector<8x384xf32> to vector<8x128xf32>
    %64 = arith.mulf %62, %38 : vector<8x128xf32>
    %65 = arith.mulf %61, %60 : vector<8x128xf32>
    %66 = arith.addf %64, %65 : vector<8x128xf32>
    %67 = math.tanh %66 : vector<8x128xf32>
    %68 = arith.mulf %63, %67 : vector<8x128xf32>
    %69 = arith.index_cast %c1_i32 : i32 to index
    %c0_30 = arith.constant 0 : index
    %c0_31 = arith.constant 0 : index
    %70 = vector.load %arg9[%69, %c0_30, %c0_31] : memref<8x8x128xf32, #tpu.memory_space<vmem>>, vector<1x8x128xf32>
    %71 = vector.shape_cast %70 : vector<1x8x128xf32> to vector<8x128xf32>
    %72 = vector.shape_cast %68 : vector<8x128xf32> to vector<1x8x128xf32>
    tpu.vector_store %arg9[%69, %c0_30, %c0_31], %72 {strides = array<i32>} : memref<8x8x128xf32, #tpu.memory_space<vmem>>, vector<1x8x128xf32>,
    %c2_i32 = arith.constant 2 : i32
    %c8_i32_32 = arith.constant 8 : i32
    %73 = arith.muli %c2_i32, %c8_i32_32 : i32
    %74 = tpu.assume_multiple %73, 8 : i32
    %75 = arith.index_cast %74 : i32 to index
    %c0_33 = arith.constant 0 : index
    %76 = vector.load %arg12[%75, %c0_33] : memref<64x512xf32, #tpu.memory_space<vmem>>, vector<8x512xf32>
    %77 = arith.truncf %68 : vector<8x128xf32> to vector<8x128xbf16>
    %c0_34 = arith.constant 0 : index
    %c0_35 = arith.constant 0 : index
    %78 = vector.load %arg5[%c0_34, %c0_35] : memref<128x512xbf16, #tpu.memory_space<vmem>>, vector<128x512xbf16>
    %cst_36 = arith.constant dense<0.000000e+00> : vector<8x512xf32>
    %79 = tpu.matmul %77, %78, %cst_36 {dimension_numbers = #tpu.dot_dimension_numbers<[1], [0], [0], [1], [0, 0, 1, 1], [], []>} : vector<8x128xbf16>, vector<128x512xbf16>, vector<8x512xf32> -> vector<8x512xf32>
    %80 = arith.addf %76, %79 : vector<8x512xf32>
    %81 = vector.extract_strided_slice %80 {offsets = [0, 0], sizes = [8, 384], strides = [1, 1]} : vector<8x512xf32> to vector<8x384xf32>
    %82 = arith.negf %81 : vector<8x384xf32>
    %83 = math.exp %82 : vector<8x384xf32>
    %cst_37 = arith.constant 1.000000e+00 : f32
    %84 = vector.broadcast %cst_37 : f32 to vector<8x384xf32>
    %85 = arith.addf %84, %83 : vector<8x384xf32>
    %86 = arith.divf %84, %85 : vector<8x384xf32>
    %87 = vector.extract_strided_slice %80 {offsets = [0, 384], sizes = [8, 128], strides = [1, 1]} : vector<8x512xf32> to vector<8x128xf32>
    %88 = math.tanh %87 : vector<8x128xf32>
    %89 = vector.extract_strided_slice %86 {offsets = [0, 0], sizes = [8, 128], strides = [1, 1]} : vector<8x384xf32> to vector<8x128xf32>
    %90 = vector.extract_strided_slice %86 {offsets = [0, 128], sizes = [8, 128], strides = [1, 1]} : vector<8x384xf32> to vector<8x128xf32>
    %91 = vector.extract_strided_slice %86 {offsets = [0, 256], sizes = [8, 128], strides = [1, 1]} : vector<8x384xf32> to vector<8x128xf32>
    %92 = arith.mulf %90, %66 : vector<8x128xf32>
    %93 = arith.mulf %89, %88 : vector<8x128xf32>
    %94 = arith.addf %92, %93 : vector<8x128xf32>
    %95 = math.tanh %94 : vector<8x128xf32>
    %96 = arith.mulf %91, %95 : vector<8x128xf32>
    %97 = arith.index_cast %c2_i32 : i32 to index
    %c0_38 = arith.constant 0 : index
    %c0_39 = arith.constant 0 : index
    %98 = vector.load %arg9[%97, %c0_38, %c0_39] : memref<8x8x128xf32, #tpu.memory_space<vmem>>, vector<1x8x128xf32>
    %99 = vector.shape_cast %98 : vector<1x8x128xf32> to vector<8x128xf32>
    %100 = vector.shape_cast %96 : vector<8x128xf32> to vector<1x8x128xf32>
    tpu.vector_store %arg9[%97, %c0_38, %c0_39], %100 {strides = array<i32>} : memref<8x8x128xf32, #tpu.memory_space<vmem>>, vector<1x8x128xf32>,
    %c3_i32 = arith.constant 3 : i32
    %c8_i32_40 = arith.constant 8 : i32
    %101 = arith.muli %c3_i32, %c8_i32_40 : i32
    %102 = tpu.assume_multiple %101, 8 : i32
    %103 = arith.index_cast %102 : i32 to index
    %c0_41 = arith.constant 0 : index
    %104 = vector.load %arg12[%103, %c0_41] : memref<64x512xf32, #tpu.memory_space<vmem>>, vector<8x512xf32>
    %105 = arith.truncf %96 : vector<8x128xf32> to vector<8x128xbf16>
    %c0_42 = arith.constant 0 : index
    %c0_43 = arith.constant 0 : index
    %106 = vector.load %arg5[%c0_42, %c0_43] : memref<128x512xbf16, #tpu.memory_space<vmem>>, vector<128x512xbf16>
    %cst_44 = arith.constant dense<0.000000e+00> : vector<8x512xf32>
    %107 = tpu.matmul %105, %106, %cst_44 {dimension_numbers = #tpu.dot_dimension_numbers<[1], [0], [0], [1], [0, 0, 1, 1], [], []>} : vector<8x128xbf16>, vector<128x512xbf16>, vector<8x512xf32> -> vector<8x512xf32>
    %108 = arith.addf %104, %107 : vector<8x512xf32>
    %109 = vector.extract_strided_slice %108 {offsets = [0, 0], sizes = [8, 384], strides = [1, 1]} : vector<8x512xf32> to vector<8x384xf32>
    %110 = arith.negf %109 : vector<8x384xf32>
    %111 = math.exp %110 : vector<8x384xf32>
    %cst_45 = arith.constant 1.000000e+00 : f32
    %112 = vector.broadcast %cst_45 : f32 to vector<8x384xf32>
    %113 = arith.addf %112, %111 : vector<8x384xf32>
    %114 = arith.divf %112, %113 : vector<8x384xf32>
    %115 = vector.extract_strided_slice %108 {offsets = [0, 384], sizes = [8, 128], strides = [1, 1]} : vector<8x512xf32> to vector<8x128xf32>
    %116 = math.tanh %115 : vector<8x128xf32>
    %117 = vector.extract_strided_slice %114 {offsets = [0, 0], sizes = [8, 128], strides = [1, 1]} : vector<8x384xf32> to vector<8x128xf32>
    %118 = vector.extract_strided_slice %114 {offsets = [0, 128], sizes = [8, 128], strides = [1, 1]} : vector<8x384xf32> to vector<8x128xf32>
    %119 = vector.extract_strided_slice %114 {offsets = [0, 256], sizes = [8, 128], strides = [1, 1]} : vector<8x384xf32> to vector<8x128xf32>
    %120 = arith.mulf %118, %94 : vector<8x128xf32>
    %121 = arith.mulf %117, %116 : vector<8x128xf32>
    %122 = arith.addf %120, %121 : vector<8x128xf32>
    %123 = math.tanh %122 : vector<8x128xf32>
    %124 = arith.mulf %119, %123 : vector<8x128xf32>
    %125 = arith.index_cast %c3_i32 : i32 to index
    %c0_46 = arith.constant 0 : index
    %c0_47 = arith.constant 0 : index
    %126 = vector.load %arg9[%125, %c0_46, %c0_47] : memref<8x8x128xf32, #tpu.memory_space<vmem>>, vector<1x8x128xf32>
    %127 = vector.shape_cast %126 : vector<1x8x128xf32> to vector<8x128xf32>
    %128 = vector.shape_cast %124 : vector<8x128xf32> to vector<1x8x128xf32>
    tpu.vector_store %arg9[%125, %c0_46, %c0_47], %128 {strides = array<i32>} : memref<8x8x128xf32, #tpu.memory_space<vmem>>, vector<1x8x128xf32>,
    %c4_i32 = arith.constant 4 : i32
    %c8_i32_48 = arith.constant 8 : i32
    %129 = arith.muli %c4_i32, %c8_i32_48 : i32
    %130 = tpu.assume_multiple %129, 8 : i32
    %131 = arith.index_cast %130 : i32 to index
    %c0_49 = arith.constant 0 : index
    %132 = vector.load %arg12[%131, %c0_49] : memref<64x512xf32, #tpu.memory_space<vmem>>, vector<8x512xf32>
    %133 = arith.truncf %124 : vector<8x128xf32> to vector<8x128xbf16>
    %c0_50 = arith.constant 0 : index
    %c0_51 = arith.constant 0 : index
    %134 = vector.load %arg5[%c0_50, %c0_51] : memref<128x512xbf16, #tpu.memory_space<vmem>>, vector<128x512xbf16>
    %cst_52 = arith.constant dense<0.000000e+00> : vector<8x512xf32>
    %135 = tpu.matmul %133, %134, %cst_52 {dimension_numbers = #tpu.dot_dimension_numbers<[1], [0], [0], [1], [0, 0, 1, 1], [], []>} : vector<8x128xbf16>, vector<128x512xbf16>, vector<8x512xf32> -> vector<8x512xf32>
    %136 = arith.addf %132, %135 : vector<8x512xf32>
    %137 = vector.extract_strided_slice %136 {offsets = [0, 0], sizes = [8, 384], strides = [1, 1]} : vector<8x512xf32> to vector<8x384xf32>
    %138 = arith.negf %137 : vector<8x384xf32>
    %139 = math.exp %138 : vector<8x384xf32>
    %cst_53 = arith.constant 1.000000e+00 : f32
    %140 = vector.broadcast %cst_53 : f32 to vector<8x384xf32>
    %141 = arith.addf %140, %139 : vector<8x384xf32>
    %142 = arith.divf %140, %141 : vector<8x384xf32>
    %143 = vector.extract_strided_slice %136 {offsets = [0, 384], sizes = [8, 128], strides = [1, 1]} : vector<8x512xf32> to vector<8x128xf32>
    %144 = math.tanh %143 : vector<8x128xf32>
    %145 = vector.extract_strided_slice %142 {offsets = [0, 0], sizes = [8, 128], strides = [1, 1]} : vector<8x384xf32> to vector<8x128xf32>
    %146 = vector.extract_strided_slice %142 {offsets = [0, 128], sizes = [8, 128], strides = [1, 1]} : vector<8x384xf32> to vector<8x128xf32>
    %147 = vector.extract_strided_slice %142 {offsets = [0, 256], sizes = [8, 128], strides = [1, 1]} : vector<8x384xf32> to vector<8x128xf32>
    %148 = arith.mulf %146, %122 : vector<8x128xf32>
    %149 = arith.mulf %145, %144 : vector<8x128xf32>
    %150 = arith.addf %148, %149 : vector<8x128xf32>
    %151 = math.tanh %150 : vector<8x128xf32>
    %152 = arith.mulf %147, %151 : vector<8x128xf32>
    %153 = arith.index_cast %c4_i32 : i32 to index
    %c0_54 = arith.constant 0 : index
    %c0_55 = arith.constant 0 : index
    %154 = vector.load %arg9[%153, %c0_54, %c0_55] : memref<8x8x128xf32, #tpu.memory_space<vmem>>, vector<1x8x128xf32>
    %155 = vector.shape_cast %154 : vector<1x8x128xf32> to vector<8x128xf32>
    %156 = vector.shape_cast %152 : vector<8x128xf32> to vector<1x8x128xf32>
    tpu.vector_store %arg9[%153, %c0_54, %c0_55], %156 {strides = array<i32>} : memref<8x8x128xf32, #tpu.memory_space<vmem>>, vector<1x8x128xf32>,
    %c5_i32 = arith.constant 5 : i32
    %c8_i32_56 = arith.constant 8 : i32
    %157 = arith.muli %c5_i32, %c8_i32_56 : i32
    %158 = tpu.assume_multiple %157, 8 : i32
    %159 = arith.index_cast %158 : i32 to index
    %c0_57 = arith.constant 0 : index
    %160 = vector.load %arg12[%159, %c0_57] : memref<64x512xf32, #tpu.memory_space<vmem>>, vector<8x512xf32>
    %161 = arith.truncf %152 : vector<8x128xf32> to vector<8x128xbf16>
    %c0_58 = arith.constant 0 : index
    %c0_59 = arith.constant 0 : index
    %162 = vector.load %arg5[%c0_58, %c0_59] : memref<128x512xbf16, #tpu.memory_space<vmem>>, vector<128x512xbf16>
    %cst_60 = arith.constant dense<0.000000e+00> : vector<8x512xf32>
    %163 = tpu.matmul %161, %162, %cst_60 {dimension_numbers = #tpu.dot_dimension_numbers<[1], [0], [0], [1], [0, 0, 1, 1], [], []>} : vector<8x128xbf16>, vector<128x512xbf16>, vector<8x512xf32> -> vector<8x512xf32>
    %164 = arith.addf %160, %163 : vector<8x512xf32>
    %165 = vector.extract_strided_slice %164 {offsets = [0, 0], sizes = [8, 384], strides = [1, 1]} : vector<8x512xf32> to vector<8x384xf32>
    %166 = arith.negf %165 : vector<8x384xf32>
    %167 = math.exp %166 : vector<8x384xf32>
    %cst_61 = arith.constant 1.000000e+00 : f32
    %168 = vector.broadcast %cst_61 : f32 to vector<8x384xf32>
    %169 = arith.addf %168, %167 : vector<8x384xf32>
    %170 = arith.divf %168, %169 : vector<8x384xf32>
    %171 = vector.extract_strided_slice %164 {offsets = [0, 384], sizes = [8, 128], strides = [1, 1]} : vector<8x512xf32> to vector<8x128xf32>
    %172 = math.tanh %171 : vector<8x128xf32>
    %173 = vector.extract_strided_slice %170 {offsets = [0, 0], sizes = [8, 128], strides = [1, 1]} : vector<8x384xf32> to vector<8x128xf32>
    %174 = vector.extract_strided_slice %170 {offsets = [0, 128], sizes = [8, 128], strides = [1, 1]} : vector<8x384xf32> to vector<8x128xf32>
    %175 = vector.extract_strided_slice %170 {offsets = [0, 256], sizes = [8, 128], strides = [1, 1]} : vector<8x384xf32> to vector<8x128xf32>
    %176 = arith.mulf %174, %150 : vector<8x128xf32>
    %177 = arith.mulf %173, %172 : vector<8x128xf32>
    %178 = arith.addf %176, %177 : vector<8x128xf32>
    %179 = math.tanh %178 : vector<8x128xf32>
    %180 = arith.mulf %175, %179 : vector<8x128xf32>
    %181 = arith.index_cast %c5_i32 : i32 to index
    %c0_62 = arith.constant 0 : index
    %c0_63 = arith.constant 0 : index
    %182 = vector.load %arg9[%181, %c0_62, %c0_63] : memref<8x8x128xf32, #tpu.memory_space<vmem>>, vector<1x8x128xf32>
    %183 = vector.shape_cast %182 : vector<1x8x128xf32> to vector<8x128xf32>
    %184 = vector.shape_cast %180 : vector<8x128xf32> to vector<1x8x128xf32>
    tpu.vector_store %arg9[%181, %c0_62, %c0_63], %184 {strides = array<i32>} : memref<8x8x128xf32, #tpu.memory_space<vmem>>, vector<1x8x128xf32>,
    %c6_i32 = arith.constant 6 : i32
    %c8_i32_64 = arith.constant 8 : i32
    %185 = arith.muli %c6_i32, %c8_i32_64 : i32
    %186 = tpu.assume_multiple %185, 8 : i32
    %187 = arith.index_cast %186 : i32 to index
    %c0_65 = arith.constant 0 : index
    %188 = vector.load %arg12[%187, %c0_65] : memref<64x512xf32, #tpu.memory_space<vmem>>, vector<8x512xf32>
    %189 = arith.truncf %180 : vector<8x128xf32> to vector<8x128xbf16>
    %c0_66 = arith.constant 0 : index
    %c0_67 = arith.constant 0 : index
    %190 = vector.load %arg5[%c0_66, %c0_67] : memref<128x512xbf16, #tpu.memory_space<vmem>>, vector<128x512xbf16>
    %cst_68 = arith.constant dense<0.000000e+00> : vector<8x512xf32>
    %191 = tpu.matmul %189, %190, %cst_68 {dimension_numbers = #tpu.dot_dimension_numbers<[1], [0], [0], [1], [0, 0, 1, 1], [], []>} : vector<8x128xbf16>, vector<128x512xbf16>, vector<8x512xf32> -> vector<8x512xf32>
    %192 = arith.addf %188, %191 : vector<8x512xf32>
    %193 = vector.extract_strided_slice %192 {offsets = [0, 0], sizes = [8, 384], strides = [1, 1]} : vector<8x512xf32> to vector<8x384xf32>
    %194 = arith.negf %193 : vector<8x384xf32>
    %195 = math.exp %194 : vector<8x384xf32>
    %cst_69 = arith.constant 1.000000e+00 : f32
    %196 = vector.broadcast %cst_69 : f32 to vector<8x384xf32>
    %197 = arith.addf %196, %195 : vector<8x384xf32>
    %198 = arith.divf %196, %197 : vector<8x384xf32>
    %199 = vector.extract_strided_slice %192 {offsets = [0, 384], sizes = [8, 128], strides = [1, 1]} : vector<8x512xf32> to vector<8x128xf32>
    %200 = math.tanh %199 : vector<8x128xf32>
    %201 = vector.extract_strided_slice %198 {offsets = [0, 0], sizes = [8, 128], strides = [1, 1]} : vector<8x384xf32> to vector<8x128xf32>
    %202 = vector.extract_strided_slice %198 {offsets = [0, 128], sizes = [8, 128], strides = [1, 1]} : vector<8x384xf32> to vector<8x128xf32>
    %203 = vector.extract_strided_slice %198 {offsets = [0, 256], sizes = [8, 128], strides = [1, 1]} : vector<8x384xf32> to vector<8x128xf32>
    %204 = arith.mulf %202, %178 : vector<8x128xf32>
    %205 = arith.mulf %201, %200 : vector<8x128xf32>
    %206 = arith.addf %204, %205 : vector<8x128xf32>
    %207 = math.tanh %206 : vector<8x128xf32>
    %208 = arith.mulf %203, %207 : vector<8x128xf32>
    %209 = arith.index_cast %c6_i32 : i32 to index
    %c0_70 = arith.constant 0 : index
    %c0_71 = arith.constant 0 : index
    %210 = vector.load %arg9[%209, %c0_70, %c0_71] : memref<8x8x128xf32, #tpu.memory_space<vmem>>, vector<1x8x128xf32>
    %211 = vector.shape_cast %210 : vector<1x8x128xf32> to vector<8x128xf32>
    %212 = vector.shape_cast %208 : vector<8x128xf32> to vector<1x8x128xf32>
    tpu.vector_store %arg9[%209, %c0_70, %c0_71], %212 {strides = array<i32>} : memref<8x8x128xf32, #tpu.memory_space<vmem>>, vector<1x8x128xf32>,
    %c7_i32 = arith.constant 7 : i32
    %c8_i32_72 = arith.constant 8 : i32
    %213 = arith.muli %c7_i32, %c8_i32_72 : i32
    %214 = tpu.assume_multiple %213, 8 : i32
    %215 = arith.index_cast %214 : i32 to index
    %c0_73 = arith.constant 0 : index
    %216 = vector.load %arg12[%215, %c0_73] : memref<64x512xf32, #tpu.memory_space<vmem>>, vector<8x512xf32>
    %217 = arith.truncf %208 : vector<8x128xf32> to vector<8x128xbf16>
    %c0_74 = arith.constant 0 : index
    %c0_75 = arith.constant 0 : index
    %218 = vector.load %arg5[%c0_74, %c0_75] : memref<128x512xbf16, #tpu.memory_space<vmem>>, vector<128x512xbf16>
    %cst_76 = arith.constant dense<0.000000e+00> : vector<8x512xf32>
    %219 = tpu.matmul %217, %218, %cst_76 {dimension_numbers = #tpu.dot_dimension_numbers<[1], [0], [0], [1], [0, 0, 1, 1], [], []>} : vector<8x128xbf16>, vector<128x512xbf16>, vector<8x512xf32> -> vector<8x512xf32>
    %220 = arith.addf %216, %219 : vector<8x512xf32>
    %221 = vector.extract_strided_slice %220 {offsets = [0, 0], sizes = [8, 384], strides = [1, 1]} : vector<8x512xf32> to vector<8x384xf32>
    %222 = arith.negf %221 : vector<8x384xf32>
    %223 = math.exp %222 : vector<8x384xf32>
    %cst_77 = arith.constant 1.000000e+00 : f32
    %224 = vector.broadcast %cst_77 : f32 to vector<8x384xf32>
    %225 = arith.addf %224, %223 : vector<8x384xf32>
    %226 = arith.divf %224, %225 : vector<8x384xf32>
    %227 = vector.extract_strided_slice %220 {offsets = [0, 384], sizes = [8, 128], strides = [1, 1]} : vector<8x512xf32> to vector<8x128xf32>
    %228 = math.tanh %227 : vector<8x128xf32>
    %229 = vector.extract_strided_slice %226 {offsets = [0, 0], sizes = [8, 128], strides = [1, 1]} : vector<8x384xf32> to vector<8x128xf32>
    %230 = vector.extract_strided_slice %226 {offsets = [0, 128], sizes = [8, 128], strides = [1, 1]} : vector<8x384xf32> to vector<8x128xf32>
    %231 = vector.extract_strided_slice %226 {offsets = [0, 256], sizes = [8, 128], strides = [1, 1]} : vector<8x384xf32> to vector<8x128xf32>
    %232 = arith.mulf %230, %206 : vector<8x128xf32>
    %233 = arith.mulf %229, %228 : vector<8x128xf32>
    %234 = arith.addf %232, %233 : vector<8x128xf32>
    %235 = math.tanh %234 : vector<8x128xf32>
    %236 = arith.mulf %231, %235 : vector<8x128xf32>
    %237 = arith.index_cast %c7_i32 : i32 to index
    %c0_78 = arith.constant 0 : index
    %c0_79 = arith.constant 0 : index
    %238 = vector.load %arg9[%237, %c0_78, %c0_79] : memref<8x8x128xf32, #tpu.memory_space<vmem>>, vector<1x8x128xf32>
    %239 = vector.shape_cast %238 : vector<1x8x128xf32> to vector<8x128xf32>
    %240 = vector.shape_cast %236 : vector<8x128xf32> to vector<1x8x128xf32>
    tpu.vector_store %arg9[%237, %c0_78, %c0_79], %240 {strides = array<i32>} : memref<8x8x128xf32, #tpu.memory_space<vmem>>, vector<1x8x128xf32>,
    %c8_i32_80 = arith.constant 8 : i32
    %c0_81 = arith.constant 0 : index
    %c0_82 = arith.constant 0 : index
    %241 = vector.load %arg10[%c0_81, %c0_82] : memref<8x128xf32, #tpu.memory_space<vmem>>, vector<8x128xf32>
    tpu.vector_store %arg10[%c0_81, %c0_82], %236 {strides = array<i32>} : memref<8x128xf32, #tpu.memory_space<vmem>>, vector<8x128xf32>,
    %c0_83 = arith.constant 0 : index
    %c0_84 = arith.constant 0 : index
    %242 = vector.load %arg11[%c0_83, %c0_84] : memref<8x128xf32, #tpu.memory_space<vmem>>, vector<8x128xf32>
    tpu.vector_store %arg11[%c0_83, %c0_84], %234 {strides = array<i32>} : memref<8x128xf32, #tpu.memory_space<vmem>>, vector<8x128xf32>,
    return
  }
  func.func @transform_0(%arg0: i32) -> (i32, i32) {
    %c0_i32 = arith.constant 0 : i32
    %c0_i32_0 = arith.constant 0 : i32
    %c0_i32_1 = arith.constant 0 : i32
    return %c0_i32, %c0_i32_0 : i32, i32
  }
  func.func @transform_1(%arg0: i32) -> (i32, i32) {
    %c0_i32 = arith.constant 0 : i32
    %c0_i32_0 = arith.constant 0 : i32
    %c0_i32_1 = arith.constant 0 : i32
    return %c0_i32, %c0_i32_0 : i32, i32
  }
  func.func @transform_2(%arg0: i32) -> (i32, i32) {
    %c0_i32 = arith.constant 0 : i32
    %c0_i32_0 = arith.constant 0 : i32
    %c0_i32_1 = arith.constant 0 : i32
    return %c0_i32, %c0_i32_0 : i32, i32
  }
  func.func @transform_3(%arg0: i32) -> (i32, i32) {
    %c0_i32 = arith.constant 0 : i32
    %c0_i32_0 = arith.constant 0 : i32
    %c0_i32_1 = arith.constant 0 : i32
    return %c0_i32, %c0_i32_0 : i32, i32
  }
  func.func @transform_4(%arg0: i32) -> (i32, i32) {
    %c0_i32 = arith.constant 0 : i32
    %c0_i32_0 = arith.constant 0 : i32
    %c0_i32_1 = arith.constant 0 : i32
    return %c0_i32, %c0_i32_0 : i32, i32
  }
  func.func @transform_5(%arg0: i32) -> (i32, i32) {
    %c0_i32 = arith.constant 0 : i32
    %c0_i32_0 = arith.constant 0 : i32
    %c0_i32_1 = arith.constant 0 : i32
    return %c0_i32, %c0_i32_0 : i32, i32
  }
  func.func @transform_6(%arg0: i32) -> (i32, i32) {
    %c0_i32 = arith.constant 0 : i32
    %c0_i32_0 = arith.constant 0 : i32
    %c0_i32_1 = arith.constant 0 : i32
    return %c0_i32, %c0_i32_0 : i32, i32
  }
  func.func @transform_7(%arg0: i32) -> (i32, i32) {
    %c0_i32 = arith.constant 0 : i32
    %c0_i32_0 = arith.constant 0 : i32
    %c0_i32_1 = arith.constant 0 : i32
    return %c0_i32, %c0_i32_0 : i32, i32
  }
  func.func @transform_8(%arg0: i32) -> (i32, i32, i32) {
    %c0_i32 = arith.constant 0 : i32
    %c0_i32_0 = arith.constant 0 : i32
    %c0_i32_1 = arith.constant 0 : i32
    %c0_i32_2 = arith.constant 0 : i32
    return %c0_i32, %c0_i32_0, %c0_i32_1 : i32, i32, i32
  }
  func.func @transform_9(%arg0: i32) -> (i32, i32) {
    %c0_i32 = arith.constant 0 : i32
    %c0_i32_0 = arith.constant 0 : i32
    %c0_i32_1 = arith.constant 0 : i32
    return %c0_i32, %c0_i32_0 : i32, i32
  }
  func.func @transform_10(%arg0: i32) -> (i32, i32) {
    %c0_i32 = arith.constant 0 : i32
    %c0_i32_0 = arith.constant 0 : i32
    %c0_i32_1 = arith.constant 0 : i32
    return %c0_i32, %c0_i32_0 : i32, i32
  }
}

</mosaic_0001>

<bundles_post_ra>
// kernel: lstm_encoder_forward.1
= control target key start
LH: loop header
LB: loop body
LE: loop exit
PB: predicated region body
PF: predicated region fallthrough
CT: control target
= control target key end

     0   :  { %vm49_vm0 = vcmask 64512   ;;  %v4715_v42 = vmov 0   ;;  %s4704_s1 = inlined_call_operand.vmem [shape: f32[8,128], index: 1, kind: input, shape index: {}]   ;;  %s4705_s0 = inlined_call_operand.vmem [shape: f32[64,8], index: 0, kind: input, shape index: {}]   ;;  %s4706_s3 = inlined_call_operand.vmem [shape: bf16[128,512], index: 3, kind: input, shape index: {}]   ;;  %s4707_s4 = inlined_call_operand.vmem [shape: bf16[128,512], index: 4, kind: input, shape index: {}]   ;;  %s4708_s2 = inlined_call_operand.vmem [shape: f32[1,128], index: 2, kind: input, shape index: {}]   ;;  %s4709_s6 = inlined_call_operand.vmem [shape: f32[8,128], index: 6, kind: input, shape index: {}, may-alias: {6,7}]   ;;  %s4710_s5 = inlined_call_operand.vmem [shape: f32[1,512], index: 5, kind: input, shape index: {}]   ;;  %s4711_s7 = inlined_call_operand.vmem [shape: f32[8,128], index: 7, kind: input, shape index: {}, may-alias: {6,7}]   ;;  %s4712_s8 = inlined_call_operand.vmem [shape: f32[8,8,128], index: 8, kind: output, shape index: {0}]   ;;  %s4713_s10 = inlined_call_operand.vmem [shape: f32[8,128], index: 10, kind: output, shape index: {2}]   ;;  %s4714_s9 = inlined_call_operand.vmem [shape: f32[8,128], index: 9, kind: output, shape index: {1}]  }
   0x1   :  { %v41_v0 = vld [vmem:[%s4704_s1] sm:$0xff]  ;;  %v34_v2 = vld [vmem:[%s4705_s0 + $0x8] sm:$0xff]  ;;  %v35_v3 = vld [vmem:[%s4705_s0 + $0x10] sm:$0xff]  ;;  %437 = vmatprep.mubr.bf16.mxu1 %v4715_v42 }
   0x2   :  { %v33_v1 = vld [vmem:[%s4705_s0] sm:$0xff]  ;;  %3438 = vmatprep.subr.mxu0 %v41_v0  ;;  %v36_v4 = vld [vmem:[%s4705_s0 + $0x18] sm:$0xff]  ;;  %v38_v10 = vld [vmem:[%s4705_s0 + $0x28] sm:$0xff] }
   0x3   :  { %3440 = vmatprep.mubr.msk.f32.mxu0 %vm49_vm0, %v33_v1  ;;  %3439 = vmatpush3.msra.mxu0 %v41_v0  ;;  %v37_v5 = vld [vmem:[%s4705_s0 + $0x20] sm:$0xff]  ;;  %v3456_v8 = vld [vmem:[%s4706_s3 + $0xe8] ss:$16 sps:$4 sm:$0xff]   ;;  %v3458_v9 = vld [vmem:[%s4706_s3 + $0xec] ss:$16 sps:$4 sm:$0xff]  }
   0x4   :  { %3441 = vmatmul.mubr.msk.f32.vlgmr.msra.gmra.mxu0 %vm49_vm0, %v34_v2  ;;  %v3453_v6 = vld [vmem:[%s4706_s3 + $0xe4] ss:$16 sps:$4 sm:$0xff]   ;;  %v3455_v7 = vld [vmem:[%s4706_s3 + $0xe0] ss:$16 sps:$4 sm:$0xff]   ;;  %478 = vmatprep.subr.bf16.mxu0 %v3458_v9  ;;  %v3462_v13 = vld [vmem:[%s4706_s3 + $0xc8] ss:$16 sps:$4 sm:$0xff]  }
   0x5   :  { %3443 = vmatprep.mubr.msk.f32.mxu0 %vm49_vm0, %v35_v3  ;;  %405 = vmatprep.subr.bf16.mxu1 %v3453_v6  ;;  %v3459_v11 = vld [vmem:[%s4706_s3 + $0xc4] ss:$16 sps:$4 sm:$0xff]   ;;  %v3461_v12 = vld [vmem:[%s4706_s3 + $0xc0] ss:$16 sps:$4 sm:$0xff]   ;;  %v3464_v14 = vld [vmem:[%s4706_s3 + $0xcc] ss:$16 sps:$4 sm:$0xff]  }
   0x6   :  { %406 = vmatpush1.bf16.msra.mxu1 %v3455_v7  ;;  %479 = vmatpush1.bf16.msra.mxu0 %v3456_v8  ;;  %v39_v15 = vld [vmem:[%s4705_s0 + $0x30] sm:$0xff]  ;;  %v40_v17 = vld [vmem:[%s4705_s0 + $0x38] sm:$0xff]  ;;  %v3929_v44 = vld [vmem:[%s4708_s2] ss:$0 sm:$0xff] }
   0x7   :  { %407 = vmatprep.subr.bf16.mxu1 %v3459_v11  ;;  %v3465_v16 = vld [vmem:[%s4706_s3 + $0xa4] ss:$16 sps:$4 sm:$0xff]   ;;  %480 = vmatprep.subr.bf16.mxu0 %v3464_v14  ;;  %v3467_v18 = vld [vmem:[%s4706_s3 + $0xa0] ss:$16 sps:$4 sm:$0xff]   ;;  %v3470_v19 = vld [vmem:[%s4706_s3 + $0xac] ss:$16 sps:$4 sm:$0xff]  }
   0x8   :  { %3444 = vmatmul.mubr.msk.f32.gmra.mxu0 %vm49_vm0, %v36_v4  ;;  %v3471_v20 = vld [vmem:[%s4706_s3 + $0x84] ss:$16 sps:$4 sm:$0xff]   ;;  %v3468_v21 = vld [vmem:[%s4706_s3 + $0xa8] ss:$16 sps:$4 sm:$0xff]   ;;  %v3476_v22 = vld [vmem:[%s4706_s3 + $0x8c] ss:$16 sps:$4 sm:$0xff]  }
   0x9   :  { %3446 = vmatprep.mubr.msk.f32.mxu0 %vm49_vm0, %v37_v5  ;;  %v3473_v23 = vld [vmem:[%s4706_s3 + $0x80] ss:$16 sps:$4 sm:$0xff]   ;;  %v3477_v24 = vld [vmem:[%s4706_s3 + $0x64] ss:$16 sps:$4 sm:$0xff]   ;;  %v3474_v25 = vld [vmem:[%s4706_s3 + $0x88] ss:$16 sps:$4 sm:$0xff]  }
   0xa   :  { %408 = vmatpush1.bf16.msra.mxu1 %v3461_v12  ;;  %481 = vmatpush1.bf16.msra.mxu0 %v3462_v13  ;;  %v3479_v26 = vld [vmem:[%s4706_s3 + $0x60] ss:$16 sps:$4 sm:$0xff]   ;;  %v3482_v27 = vld [vmem:[%s4706_s3 + $0x6c] ss:$16 sps:$4 sm:$0xff]   ;;  %v3480_v28 = vld [vmem:[%s4706_s3 + $0x68] ss:$16 sps:$4 sm:$0xff]  }
   0xb   :  { %409 = vmatprep.subr.bf16.mxu1 %v3465_v16  ;;  %482 = vmatprep.subr.bf16.mxu0 %v3470_v19  ;;  %v3483_v29 = vld [vmem:[%s4706_s3 + $0x44] ss:$16 sps:$4 sm:$0xff]   ;;  %v3488_v30 = vld [vmem:[%s4706_s3 + $0x4c] ss:$16 sps:$4 sm:$0xff]   ;;  %v3485_v31 = vld [vmem:[%s4706_s3 + $0x40] ss:$16 sps:$4 sm:$0xff]  }
   0xc   :  { %3447 = vmatmul.mubr.msk.f32.gmra.mxu0 %vm49_vm0, %v38_v10  ;;  %v3486_v32 = vld [vmem:[%s4706_s3 + $0x48] ss:$16 sps:$4 sm:$0xff]   ;;  %v3489_v33 = vld [vmem:[%s4706_s3 + $0x24] ss:$16 sps:$4 sm:$0xff]   ;;  %v3494_v34 = vld [vmem:[%s4706_s3 + $0x2c] ss:$16 sps:$4 sm:$0xff]  }
   0xd   :  { %3449 = vmatprep.mubr.msk.f32.mxu0 %vm49_vm0, %v39_v15  ;;  %v3491_v35 = vld [vmem:[%s4706_s3 + $0x20] ss:$16 sps:$4 sm:$0xff]   ;;  %v3492_v36 = vld [vmem:[%s4706_s3 + $0x28] ss:$16 sps:$4 sm:$0xff]   ;;  %v3495_v37 = vld [vmem:[%s4706_s3 + $0x4] ss:$16 sps:$4 sm:$0xff]  }
   0xe   :  { %410 = vmatpush1.bf16.msra.mxu1 %v3467_v18  ;;  %483 = vmatpush1.bf16.msra.mxu0 %v3468_v21  ;;  %v3500_v38 = vld [vmem:[%s4706_s3 + $0xc] ss:$16 sps:$4 sm:$0xff]   ;;  %v3497_v39 = vld [vmem:[%s4706_s3] ss:$16 sps:$4 sm:$0xff]   ;;  %v3498_v40 = vld [vmem:[%s4706_s3 + $0x8] ss:$16 sps:$4 sm:$0xff]  }
   0xf   :  { %411 = vmatprep.subr.bf16.mxu1 %v3471_v20  ;;  %484 = vmatprep.subr.bf16.mxu0 %v3476_v22  ;;  %v3915_v41 = vld [vmem:[%s4707_s4 + $0xe4] ss:$16 sps:$4 sm:$0xff]   ;;  %v3923_v43 = vld [vmem:[%s4707_s4 + $0xec] ss:$16 sps:$4 sm:$0xff]   ;;  %v3936_v53 = vld [vmem:[%s4707_s4 + $0xe0] ss:$16 sps:$4 sm:$0xff]  }
  0x10   :  { %3450 = vmatmul.mubr.msk.f32.gmra.mxu0 %vm49_vm0, %v40_v17  ;;  %v3941_v54 = vld [vmem:[%s4707_s4 + $0xe8] ss:$16 sps:$4 sm:$0xff]   ;;  %v3948_v58 = vld [vmem:[%s4707_s4 + $0xc4] ss:$16 sps:$4 sm:$0xff]   ;;  %v3953_v59 = vld [vmem:[%s4707_s4 + $0xcc] ss:$16 sps:$4 sm:$0xff]  }
  0x11   :  { %510 = vmatprep.mubr.bf16.mxu0 %v4715_v42  ;;  %v3960_v61 = vld [vmem:[%s4707_s4 + $0xc0] ss:$16 sps:$4 sm:$0xff]   ;;  %v3965_v62 = vld [vmem:[%s4707_s4 + $0xc8] ss:$16 sps:$4 sm:$0xff]   ;;  %v3972_v1 = vld [vmem:[%s4707_s4 + $0xa4] ss:$16 sps:$4 sm:$0xff]  }
  0x12   :  { %412 = vmatpush1.bf16.msra.mxu1 %v3473_v23  ;;  %485 = vmatpush1.bf16.msra.mxu0 %v3474_v25  ;;  %v3977_v2 = vld [vmem:[%s4707_s4 + $0xac] ss:$16 sps:$4 sm:$0xff]   ;;  %v3986_v4 = vld [vmem:[%s4707_s4 + $0xa0] ss:$16 sps:$4 sm:$0xff]   ;;  %v3991_v5 = vld [vmem:[%s4707_s4 + $0xa8] ss:$16 sps:$4 sm:$0xff]  }
  0x13   :  { %413 = vmatprep.subr.bf16.mxu1 %v3477_v24  ;;  %486 = vmatprep.subr.bf16.mxu0 %v3482_v27  ;;  %v4000_v9 = vld [vmem:[%s4707_s4 + $0x84] ss:$16 sps:$4 sm:$0xff]   ;;  %v4005_v10 = vld [vmem:[%s4707_s4 + $0x8c] ss:$16 sps:$4 sm:$0xff]   ;;  %v4012_v12 = vld [vmem:[%s4707_s4 + $0x80] ss:$16 sps:$4 sm:$0xff]  }
  0x14   :  { %v4017_v13 = vld [vmem:[%s4707_s4 + $0x88] ss:$16 sps:$4 sm:$0xff]   ;;  %v4024_v16 = vld [vmem:[%s4707_s4 + $0x64] ss:$16 sps:$4 sm:$0xff]   ;;  %v4029_v17 = vld [vmem:[%s4707_s4 + $0x6c] ss:$16 sps:$4 sm:$0xff]  }
  0x15   :  { %v4038_v19 = vld [vmem:[%s4707_s4 + $0x60] ss:$16 sps:$4 sm:$0xff]   ;;  %v4043_v20 = vld [vmem:[%s4707_s4 + $0x68] ss:$16 sps:$4 sm:$0xff]   ;;  %v4052_v24 = vld [vmem:[%s4707_s4 + $0x44] ss:$16 sps:$4 sm:$0xff]  }
  0x16   :  { %414 = vmatpush1.bf16.msra.mxu1 %v3479_v26  ;;  %487 = vmatpush1.bf16.msra.mxu0 %v3480_v28  ;;  %v4057_v25 = vld [vmem:[%s4707_s4 + $0x4c] ss:$16 sps:$4 sm:$0xff]   ;;  %v4064_v26 = vld [vmem:[%s4707_s4 + $0x40] ss:$16 sps:$4 sm:$0xff]   ;;  %v4069_v27 = vld [vmem:[%s4707_s4 + $0x48] ss:$16 sps:$4 sm:$0xff]  }
  0x17   :  { %415 = vmatprep.subr.bf16.mxu1 %v3483_v29  ;;  %488 = vmatprep.subr.bf16.mxu0 %v3488_v30  ;;  %v4076_v30 = vld [vmem:[%s4707_s4 + $0x24] ss:$16 sps:$4 sm:$0xff]  }
  0x1a   :  { %416 = vmatpush1.bf16.msra.mxu1 %v3485_v31  ;;  %489 = vmatpush1.bf16.msra.mxu0 %v3486_v32  ;;  %v4081_v31 = vld [vmem:[%s4707_s4 + $0x2c] ss:$16 sps:$4 sm:$0xff]   ;;  %v4090_v32 = vld [vmem:[%s4707_s4 + $0x20] ss:$16 sps:$4 sm:$0xff]  }
  0x1b   :  { %417 = vmatprep.subr.bf16.mxu1 %v3489_v33  ;;  %490 = vmatprep.subr.bf16.mxu0 %v3494_v34  ;;  %v4095_v33 = vld [vmem:[%s4707_s4 + $0x28] ss:$16 sps:$4 sm:$0xff]  }
  0x1e   :  { %418 = vmatpush1.bf16.msra.mxu1 %v3491_v35  ;;  %491 = vmatpush1.bf16.msra.mxu0 %v3492_v36  ;;  %v4102_v35 = vld [vmem:[%s4707_s4 + $0x4] ss:$16 sps:$4 sm:$0xff]   ;;  %v4107_v36 = vld [vmem:[%s4707_s4 + $0xc] ss:$16 sps:$4 sm:$0xff]  }
  0x1f   :  { %419 = vmatprep.subr.bf16.mxu1 %v3495_v37  ;;  %492 = vmatprep.subr.bf16.mxu0 %v3500_v38  ;;  %v4114_v37 = vld [vmem:[%s4707_s4] ss:$16 sps:$4 sm:$0xff]   ;;  %v4119_v38 = vld [vmem:[%s4707_s4 + $0x8] ss:$16 sps:$4 sm:$0xff]  }
  0x22   :  { %420 = vmatpush1.bf16.msra.mxu1 %v3497_v39  ;;  %493 = vmatpush1.bf16.msra.mxu0 %v3498_v40  ;;  %v583_v39 = vld [vmem:[%s4709_s6] sm:$0xff] }
  0x23   :  { %785 = vmatprep.subr.bf16.mxu1 %v3915_v41  ;;  %826 = vmatprep.subr.bf16.mxu0 %v3923_v43  ;;  %v592_v40 = vpack.c.bf16 %v583_v39, %v583_v39 }
  0xc4   :  { %v3442_v45 = vpop.f32.mrf.mxu0 }
  0xc5   :  { %v146_v46 = vadd.f32 %v3442_v45, %v3929_v44 }
  0xc6   :  { %v140_v47 = vpop.f32.mrf.mxu0 }
  0xc7   :  { %v141_v48 = vadd.f32 %v3929_v44, %v140_v47  ;;  %v180_v50 = vmax.f32 %v146_v46, 0.0 }
  0xc8   :  { %v3445_v49 = vpop.f32.mrf.mxu0 }
  0xc9   :  { %v179_v51 = vmax.f32 %v141_v48, 0.0  ;;  %v156_v56 = vadd.f32 %v3445_v49, %v3929_v44  ;;  %v223_v48 = vld [vmem:[%s4710_s5] sm:$0xf] }
  0xca   :  { %v150_v52 = vpop.f32.mrf.mxu0 }
  0xcb   :  { %v187_v55 = vpack.c.bf16 %v180_v50, %v179_v51  ;;  %v151_v57 = vadd.f32 %v3929_v44, %v150_v52  ;;  %v182_v63 = vmax.f32 %v156_v56, 0.0 }
  0xcc   :  { %v3448_v60 = vpop.f32.mrf.mxu0 }
  0xcd   :  { %438 = vmatmul.mubr.bf16.vlgmr.msra.gmra.mxu1 %v187_v55  ;;  %511 = vmatmul.mubr.bf16.vlgmr.msra.gmra.mxu0 %v187_v55  ;;  %v181_v0 = vmax.f32 %v151_v57, 0.0  ;;  %v166_v7 = vadd.f32 %v3448_v60, %v3929_v44 }
  0xce   :  { %786 = vmatpush1.bf16.msra.mxu1 %v3936_v53  ;;  %827 = vmatpush1.bf16.msra.mxu0 %v3941_v54  ;;  %v160_v3 = vpop.f32.mrf.mxu0 }
  0xcf   :  { %787 = vmatprep.subr.bf16.mxu1 %v3948_v58  ;;  %828 = vmatprep.subr.bf16.mxu0 %v3953_v59  ;;  %v188_v6 = vpack.c.bf16 %v182_v63, %v181_v0  ;;  %v161_v8 = vadd.f32 %v3929_v44, %v160_v3  ;;  %v184_v14 = vmax.f32 %v166_v7, 0.0 }
  0xd0   :  { %447 = vmatprep.mubr.bf16.mxu1 %v4715_v42  ;;  %520 = vmatprep.mubr.bf16.mxu0 %v4715_v42  ;;  %v3451_v11 = vpop.f32.mrf.mxu0 }
  0xd1   :  { %v183_v15 = vmax.f32 %v161_v8, 0.0  ;;  %v176_v22 = vadd.f32 %v3451_v11, %v3929_v44 }
  0xd2   :  { %788 = vmatpush1.bf16.msra.mxu1 %v3960_v61  ;;  %829 = vmatpush1.bf16.msra.mxu0 %v3965_v62  ;;  %v170_v18 = vpop.f32.mrf.mxu0 }
  0xd3   :  { %789 = vmatprep.subr.bf16.mxu1 %v3972_v1  ;;  %830 = vmatprep.subr.bf16.mxu0 %v3977_v2  ;;  %v189_v21 = vpack.c.bf16 %v184_v14, %v183_v15  ;;  %v171_v23 = vadd.f32 %v3929_v44, %v170_v18  ;;  %v186_v28 = vmax.f32 %v176_v22, 0.0  ;;  %v225_v44 = vlaneseq }
  0xd5   :  { %448 = vmatmul.mubr.bf16.gmra.mxu1 %v188_v6  ;;  %521 = vmatmul.mubr.bf16.gmra.mxu0 %v188_v6  ;;  %v185_v29 = vmax.f32 %v171_v23, 0.0  ;;  %v226_v45 = vshrl.u32 %v225_v44, 7 }
  0xd6   :  { %790 = vmatpush1.bf16.msra.mxu1 %v3986_v4  ;;  %831 = vmatpush1.bf16.msra.mxu0 %v3991_v5 }
  0xd7   :  { %791 = vmatprep.subr.bf16.mxu1 %v4000_v9  ;;  %832 = vmatprep.subr.bf16.mxu0 %v4005_v10  ;;  %v190_v34 = vpack.c.bf16 %v186_v28, %v185_v29  ;;  %v227_v46 = vsub.s32 0, %v226_v45  ;;  %v235_v47 = vsub.s32 2, %v226_v45  ;;  %v231_v51 = vsub.s32 1, %v226_v45 }
  0xd8   :  { %457 = vmatprep.mubr.bf16.mxu1 %v4715_v42  ;;  %530 = vmatprep.mubr.bf16.mxu0 %v4715_v42  ;;  %v239_v52 = vsub.s32 3, %v226_v45 }
  0xd9   :  { %v228_v57 = vrot.slane %v223_v48, %v227_v46  ;;  %v4177_v60 = vrot.slane %v223_v48, %v235_v47  ;;  %v232_v3 = vrot.slane %v223_v48, %v231_v51 }
  0xda   :  { %792 = vmatpush1.bf16.msra.mxu1 %v4012_v12  ;;  %833 = vmatpush1.bf16.msra.mxu0 %v4017_v13  ;;  %v4179_v6 = vrot.slane %v223_v48, %v239_v52 }
  0xdb   :  { %793 = vmatprep.subr.bf16.mxu1 %v4024_v16  ;;  %834 = vmatprep.subr.bf16.mxu0 %v4029_v17 }
  0xdd   :  { %458 = vmatmul.mubr.bf16.gmra.mxu1 %v189_v21  ;;  %531 = vmatmul.mubr.bf16.gmra.mxu0 %v189_v21 }
  0xde   :  { %794 = vmatpush1.bf16.msra.mxu1 %v4038_v19  ;;  %835 = vmatpush1.bf16.msra.mxu0 %v4043_v20 }
  0xdf   :  { %795 = vmatprep.subr.bf16.mxu1 %v4052_v24  ;;  %836 = vmatprep.subr.bf16.mxu0 %v4057_v25 }
  0xe0   :  { %467 = vmatprep.mubr.bf16.mxu1 %v4715_v42  ;;  %540 = vmatprep.mubr.bf16.mxu0 %v4715_v42 }
  0xe2   :  { %796 = vmatpush1.bf16.msra.mxu1 %v4064_v26  ;;  %837 = vmatpush1.bf16.msra.mxu0 %v4069_v27 }
  0xe3   :  { %797 = vmatprep.subr.bf16.mxu1 %v4076_v30  ;;  %838 = vmatprep.subr.bf16.mxu0 %v4081_v31 }
  0xe5   :  { %468 = vmatmul.mubr.bf16.gmra.mxu1 %v190_v34  ;;  %541 = vmatmul.mubr.bf16.gmra.mxu0 %v190_v34 }
  0xe6   :  { %798 = vmatpush1.bf16.msra.mxu1 %v4090_v32  ;;  %839 = vmatpush1.bf16.msra.mxu0 %v4095_v33 }
  0xe7   :  { %799 = vmatprep.subr.bf16.mxu1 %v4102_v35  ;;  %840 = vmatprep.subr.bf16.mxu0 %v4107_v36 }
  0xe8   :  { %817 = vmatprep.mubr.bf16.mxu1 %v4715_v42  ;;  %858 = vmatprep.mubr.bf16.mxu0 %v4715_v42 }
  0xea   :  { %800 = vmatpush1.bf16.msra.mxu1 %v4114_v37  ;;  %841 = vmatpush1.bf16.msra.mxu0 %v4119_v38 }
  0xeb   :  { %1096 = vmatprep.subr.bf16.mxu1 %v3915_v41  ;;  %1137 = vmatprep.subr.bf16.mxu0 %v3923_v43 }
  0xed   :  { %818 = vmatmul.mubr.bf16.vlgmr.msra.gmra.mxu1 %v592_v40  ;;  %859 = vmatmul.mubr.bf16.vlgmr.msra.gmra.mxu0 %v592_v40 }
  0xee   :  { %1097 = vmatpush1.bf16.msra.mxu1 %v3936_v53  ;;  %1138 = vmatpush1.bf16.msra.mxu0 %v3941_v54 }
  0xef   :  { %1098 = vmatprep.subr.bf16.mxu1 %v3948_v58  ;;  %1139 = vmatprep.subr.bf16.mxu0 %v3953_v59 }
  0xf0   :  { %1128 = vmatprep.mubr.bf16.mxu1 %v4715_v42  ;;  %1169 = vmatprep.mubr.bf16.mxu0 %v4715_v42 }
  0xf2   :  { %1099 = vmatpush1.bf16.msra.mxu1 %v3960_v61  ;;  %1140 = vmatpush1.bf16.msra.mxu0 %v3965_v62 }
  0xf3   :  { %1100 = vmatprep.subr.bf16.mxu1 %v3972_v1  ;;  %1141 = vmatprep.subr.bf16.mxu0 %v3977_v2 }
  0xf6   :  { %1101 = vmatpush1.bf16.msra.mxu1 %v3986_v4  ;;  %1142 = vmatpush1.bf16.msra.mxu0 %v3991_v5 }
  0xf7   :  { %1102 = vmatprep.subr.bf16.mxu1 %v4000_v9  ;;  %1143 = vmatprep.subr.bf16.mxu0 %v4005_v10 }
  0xfa   :  { %1103 = vmatpush1.bf16.msra.mxu1 %v4012_v12  ;;  %1144 = vmatpush1.bf16.msra.mxu0 %v4017_v13 }
  0xfb   :  { %1104 = vmatprep.subr.bf16.mxu1 %v4024_v16  ;;  %1145 = vmatprep.subr.bf16.mxu0 %v4029_v17 }
  0xfe   :  { %1105 = vmatpush1.bf16.msra.mxu1 %v4038_v19  ;;  %1146 = vmatpush1.bf16.msra.mxu0 %v4043_v20 }
  0xff   :  { %1106 = vmatprep.subr.bf16.mxu1 %v4052_v24  ;;  %1147 = vmatprep.subr.bf16.mxu0 %v4057_v25 }
 0x102   :  { %1107 = vmatpush1.bf16.msra.mxu1 %v4064_v26  ;;  %1148 = vmatpush1.bf16.msra.mxu0 %v4069_v27 }
 0x103   :  { %1108 = vmatprep.subr.bf16.mxu1 %v4076_v30  ;;  %1149 = vmatprep.subr.bf16.mxu0 %v4081_v31 }
 0x106   :  { %1109 = vmatpush1.bf16.msra.mxu1 %v4090_v32  ;;  %1150 = vmatpush1.bf16.msra.mxu0 %v4095_v33 }
 0x107   :  { %1110 = vmatprep.subr.bf16.mxu1 %v4102_v35  ;;  %1151 = vmatprep.subr.bf16.mxu0 %v4107_v36 }
 0x10a   :  { %1111 = vmatpush1.bf16.msra.mxu1 %v4114_v37  ;;  %1152 = vmatpush1.bf16.msra.mxu0 %v4119_v38 }
 0x10b   :  { %1408 = vmatprep.subr.bf16.mxu1 %v3915_v41  ;;  %1449 = vmatprep.subr.bf16.mxu0 %v3923_v43 }
 0x18d   :  { %v4169_v49 = vpop.f32.mrf.mxu1  ;;  %v4171_v50 = vpop.f32.mrf.mxu0 }
 0x18f   :  { %v4173_v55 = vpop.f32.mrf.mxu1  ;;  %v4175_v56 = vpop.f32.mrf.mxu0 }
 0x191   :  { %v443_v63 = vpop.f32.mrf.mxu1  ;;  %v516_v0 = vpop.f32.mrf.mxu0 }
 0x192   :  { %v4181_v7 = vadd.f32 %v443_v63, %v228_v57  ;;  %v4184_v8 = vadd.f32 %v516_v0, %v4177_v60 }
 0x193   :  { %v445_v11 = vpop.f32.mrf.mxu1  ;;  %v518_v14 = vpop.f32.mrf.mxu0 }
 0x194   :  { %v4186_v15 = vadd.f32 %v445_v11, %v232_v3  ;;  %v4189_v18 = vadd.f32 %v518_v14, %v4179_v6 }
 0x195   :  { %v449_v21 = vpop.f32.mrf.mxu1  ;;  %v522_v22 = vpop.f32.mrf.mxu0 }
 0x196   :  { %v4191_v23 = vadd.f32 %v449_v21, %v228_v57  ;;  %v4194_v28 = vadd.f32 %v522_v22, %v4177_v60 }
 0x197   :  { %v451_v29 = vpop.f32.mrf.mxu1  ;;  %v524_v34 = vpop.f32.mrf.mxu0 }
 0x198   :  { %v4196_v39 = vadd.f32 %v451_v29, %v232_v3  ;;  %v4199_v40 = vadd.f32 %v524_v34, %v4179_v6 }
 0x199   :  { %v453_v44 = vpop.f32.mrf.mxu1  ;;  %v526_v45 = vpop.f32.mrf.mxu0 }
 0x19a   :  { %4717 = vst [vmem:[#allocation3_spill] sm:$0xff] %v4199_v40  ;;  %v4201_v46 = vadd.f32 %v453_v44, %v228_v57  ;;  %v4204_v47 = vadd.f32 %v526_v45, %v4177_v60 }
 0x19b   :  { %v455_v48 = vpop.f32.mrf.mxu1  ;;  %v528_v51 = vpop.f32.mrf.mxu0 }
 0x19c   :  { %4718 = vst [vmem:[#allocation4_spill] sm:$0xff] %v4201_v46  ;;  %4719 = vst [vmem:[#allocation5_spill] sm:$0xff] %v4204_v47  ;;  %v4206_v52 = vadd.f32 %v455_v48, %v232_v3  ;;  %v4209_v63 = vadd.f32 %v528_v51, %v4179_v6 }
 0x19d   :  { %v459_v0 = vpop.f32.mrf.mxu1  ;;  %v532_v11 = vpop.f32.mrf.mxu0 }
 0x19e   :  { %4720 = vst [vmem:[#allocation6_spill] sm:$0xff] %v4206_v52  ;;  %4721 = vst [vmem:[#allocation7_spill] sm:$0xff] %v4209_v63  ;;  %v4211_v14 = vadd.f32 %v459_v0, %v228_v57  ;;  %v4214_v21 = vadd.f32 %v532_v11, %v4177_v60 }
 0x19f   :  { %v461_v22 = vpop.f32.mrf.mxu1  ;;  %v534_v29 = vpop.f32.mrf.mxu0 }
 0x1a0   :  { %4722 = vst [vmem:[#allocation8_spill] sm:$0xff] %v4211_v14  ;;  %4723 = vst [vmem:[#allocation9_spill] sm:$0xff] %v4214_v21  ;;  %v4216_v34 = vadd.f32 %v461_v22, %v232_v3  ;;  %v4219_v44 = vadd.f32 %v534_v29, %v4179_v6 }
 0x1a1   :  { %v463_v45 = vpop.f32.mrf.mxu1  ;;  %v536_v48 = vpop.f32.mrf.mxu0 }
 0x1a2   :  { %4724 = vst [vmem:[#allocation10_spill] sm:$0xff] %v4216_v34  ;;  %4725 = vst [vmem:[#allocation11_spill] sm:$0xff] %v4219_v44  ;;  %v4221_v42 = vadd.f32 %v463_v45, %v228_v57  ;;  %v4224_v51 = vadd.f32 %v536_v48, %v4177_v60 }
 0x1a3   :  { %v465_v63 = vpop.f32.mrf.mxu1  ;;  %v538_v0 = vpop.f32.mrf.mxu0 }
 0x1a4   :  { %4726 = vst [vmem:[#allocation12_spill] sm:$0xff] %v4221_v42  ;;  %4727 = vst [vmem:[#allocation13_spill] sm:$0xff] %v4224_v51  ;;  %v4226_v14 = vadd.f32 %v465_v63, %v232_v3  ;;  %v4229_v11 = vadd.f32 %v538_v0, %v4179_v6 }
 0x1a5   :  { %v469_v21 = vpop.f32.mrf.mxu1  ;;  %v542_v22 = vpop.f32.mrf.mxu0 }
 0x1a6   :  { %4728 = vst [vmem:[#allocation14_spill] sm:$0xff] %v4226_v14  ;;  %4729 = vst [vmem:[#allocation15_spill] sm:$0xff] %v4229_v11  ;;  %v4231_v34 = vadd.f32 %v469_v21, %v228_v57  ;;  %v4234_v29 = vadd.f32 %v542_v22, %v4177_v60 }
 0x1a7   :  { %v471_v44 = vpop.f32.mrf.mxu1  ;;  %v544_v45 = vpop.f32.mrf.mxu0 }
 0x1a8   :  { %4730 = vst [vmem:[#allocation16_spill] sm:$0xff] %v4231_v34  ;;  %4731 = vst [vmem:[#allocation17_spill] sm:$0xff] %v4234_v29  ;;  %v4236_v42 = vadd.f32 %v471_v44, %v232_v3  ;;  %v4239_v48 = vadd.f32 %v544_v45, %v4179_v6  ;;  %v440_v34 = vadd.f32 %v4169_v49, %v228_v57 }
 0x1a9   :  { %v473_v51 = vpop.f32.mrf.mxu1  ;;  %v546_v63 = vpop.f32.mrf.mxu0  ;;  %v442_v45 = vadd.f32 %v4173_v55, %v232_v3 }
 0x1aa   :  { %4732 = vst [vmem:[#allocation18_spill] sm:$0xff] %v4236_v42  ;;  %4733 = vst [vmem:[#allocation19_spill] sm:$0xff] %v4239_v48  ;;  %v4241_v14 = vadd.f32 %v473_v51, %v228_v57  ;;  %v4244_v0 = vadd.f32 %v546_v63, %v4177_v60  ;;  %v513_v57 = vadd.f32 %v4171_v50, %v4177_v60  ;;  %v584_v50 = vld [vmem:[%s4711_s7] sm:$0xff] }
 0x1ab   :  { %v475_v11 = vpop.f32.mrf.mxu1  ;;  %v548_v21 = vpop.f32.mrf.mxu0 }
 0x1ac   :  { %4734 = vst [vmem:[#allocation20_spill] sm:$0xff] %v4241_v14  ;;  %4735 = vst [vmem:[#allocation21_spill] sm:$0xff] %v4244_v0  ;;  %v4247_v22 = vadd.f32 %v475_v11, %v232_v3  ;;  %v4250_v29 = vadd.f32 %v548_v21, %v4179_v6  ;;  %v515_v21 = vadd.f32 %v4175_v56, %v4179_v6 }
 0x1ad   :  { %v819_v44 = vpop.f32.mrf.mxu1  ;;  %v860_v42 = vpop.f32.mrf.mxu0 }
 0x1ae   :  { %v867_v48 = vadd.f32 %v819_v44, %v440_v34  ;;  %v869_v11 = vadd.f32 %v860_v42, %v513_v57 }
 0x1af   :  { %v821_v47 = vpop.f32.mrf.mxu1  ;;  %v862_v51 = vpop.f32.mrf.mxu0 }
 0x1b0   :  { %v3174_v14 = vmul.f32 -1.442695, %v867_v48  ;;  %v868_v52 = vadd.f32 %v821_v47, %v442_v45  ;;  %v3176_v55 = vmul.f32 -1.442695, %v869_v11  ;;  %v870_v34 = vadd.f32 %v862_v51, %v515_v21 }
 0x1b1   :  { %v823_v63 = vpop.f32.mrf.mxu1  ;;  %v864_v0 = vpop.f32.mrf.mxu0 }
 0x1b2   :  { %3597 = vpow2.f32 %v3174_v14  ;;  %v3175_v46 = vmul.f32 -1.442695, %v868_v52 }
 0x1b3   :  { %v824_v40 = vpop.f32.mrf.mxu1  ;;  %v865_v49 = vpop.f32.mrf.mxu0 }
 0x1b4   :  { %3599 = vpow2.f32 %v3175_v46  ;;  %v4736_v49 = vmov 0  }
 0x1b5   :  { %3601 = vpow2.f32 %v3176_v55 }
 0x1bf   :  { %v3598_v3 = vpop.eup %3597 }
 0x1c0   :  { %v880_v44 = vadd.f32 1.0, %v3598_v3 }
 0x1c1   :  { %v3600_v48 = vpop.eup %3599 }
 0x1c2   :  { %3603 = vrcp.f32 %v880_v44  ;;  %v881_v47 = vadd.f32 1.0, %v3600_v48  ;;  %v3602_v40 = vpop.eup %3601 }
 0x1c3   :  { %3605 = vtanh.f32 %v870_v34  ;;  %v882_v46 = vadd.f32 1.0, %v3602_v40 }
 0x1c4   :  { %3607 = vrcp.f32 %v881_v47 }
 0x1c5   :  { %3609 = vrcp.f32 %v882_v46 }
 0x1cf   :  { %v3604_v52 = vpop.eup %3603 }
 0x1d0   :  { %v3606_v42 = vpop.eup %3605 }
 0x1d1   :  { %v3608_v60 = vpop.eup %3607  ;;  %v891_v6 = vmul.f32 %v3606_v42, %v3604_v52 }
 0x1d2   :  { %v890_v56 = vmul.f32 %v3608_v60, %v584_v50  ;;  %v3610_v0 = vpop.eup %3609 }
 0x1d4   :  { %v4260_v14 = vadd.f32 %v891_v6, %v890_v56 }
 0x1d6   :  { %3611 = vtanh.f32 %v4260_v14 }
 0x1e3   :  { %v3612_v45 = vpop.eup %3611 }
 0x1e4   :  { %v894_v51 = vmul.f32 %v3612_v45, %v3610_v0 }
 0x1e6   :  { %895 = vst [vmem:[%s4712_s8] sm:$0xff] %v894_v51  ;;  %v903_v63 = vpack.c.bf16 %v894_v51, %v894_v51 }
 0x1e8   :  { %1129 = vmatmul.mubr.bf16.vlgmr.msra.gmra.mxu1 %v903_v63  ;;  %1170 = vmatmul.mubr.bf16.vlgmr.msra.gmra.mxu0 %v903_v63 }
 0x1e9   :  { %1409 = vmatpush1.bf16.msra.mxu1 %v3936_v53  ;;  %1450 = vmatpush1.bf16.msra.mxu0 %v3941_v54 }
 0x1ea   :  { %1410 = vmatprep.subr.bf16.mxu1 %v3948_v58  ;;  %1451 = vmatprep.subr.bf16.mxu0 %v3953_v59 }
 0x1eb   :  { %1440 = vmatprep.mubr.bf16.mxu1 %v4736_v49  ;;  %1481 = vmatprep.mubr.bf16.mxu0 %v4736_v49 }
 0x1ed   :  { %1411 = vmatpush1.bf16.msra.mxu1 %v3960_v61  ;;  %1452 = vmatpush1.bf16.msra.mxu0 %v3965_v62 }
 0x1ee   :  { %1412 = vmatprep.subr.bf16.mxu1 %v3972_v1  ;;  %1453 = vmatprep.subr.bf16.mxu0 %v3977_v2 }
 0x1f1   :  { %1413 = vmatpush1.bf16.msra.mxu1 %v3986_v4  ;;  %1454 = vmatpush1.bf16.msra.mxu0 %v3991_v5 }
 0x1f2   :  { %1414 = vmatprep.subr.bf16.mxu1 %v4000_v9  ;;  %1455 = vmatprep.subr.bf16.mxu0 %v4005_v10 }
 0x1f5   :  { %1415 = vmatpush1.bf16.msra.mxu1 %v4012_v12  ;;  %1456 = vmatpush1.bf16.msra.mxu0 %v4017_v13 }
 0x1f6   :  { %1416 = vmatprep.subr.bf16.mxu1 %v4024_v16  ;;  %1457 = vmatprep.subr.bf16.mxu0 %v4029_v17 }
 0x1f9   :  { %1417 = vmatpush1.bf16.msra.mxu1 %v4038_v19  ;;  %1458 = vmatpush1.bf16.msra.mxu0 %v4043_v20 }
 0x1fa   :  { %1418 = vmatprep.subr.bf16.mxu1 %v4052_v24  ;;  %1459 = vmatprep.subr.bf16.mxu0 %v4057_v25 }
 0x1fd   :  { %1419 = vmatpush1.bf16.msra.mxu1 %v4064_v26  ;;  %1460 = vmatpush1.bf16.msra.mxu0 %v4069_v27 }
 0x1fe   :  { %1420 = vmatprep.subr.bf16.mxu1 %v4076_v30  ;;  %1461 = vmatprep.subr.bf16.mxu0 %v4081_v31 }
 0x201   :  { %1421 = vmatpush1.bf16.msra.mxu1 %v4090_v32  ;;  %1462 = vmatpush1.bf16.msra.mxu0 %v4095_v33 }
 0x202   :  { %1422 = vmatprep.subr.bf16.mxu1 %v4102_v35  ;;  %1463 = vmatprep.subr.bf16.mxu0 %v4107_v36 }
 0x205   :  { %1423 = vmatpush1.bf16.msra.mxu1 %v4114_v37  ;;  %1464 = vmatpush1.bf16.msra.mxu0 %v4119_v38 }
 0x206   :  { %1720 = vmatprep.subr.bf16.mxu1 %v3915_v41  ;;  %1761 = vmatprep.subr.bf16.mxu0 %v3923_v43 }
 0x2a8   :  { %v1130_v57 = vpop.f32.mrf.mxu1  ;;  %v1171_v11 = vpop.f32.mrf.mxu0 }
 0x2a9   :  { %v1178_v21 = vadd.f32 %v1130_v57, %v4181_v7  ;;  %v1180_v41 = vadd.f32 %v1171_v11, %v4184_v8 }
 0x2aa   :  { %v1132_v55 = vpop.f32.mrf.mxu1  ;;  %v1173_v3 = vpop.f32.mrf.mxu0 }
 0x2ab   :  { %v3209_v34 = vmul.f32 -1.442695, %v1178_v21  ;;  %v1179_v44 = vadd.f32 %v1132_v55, %v4186_v15  ;;  %v3211_v42 = vmul.f32 -1.442695, %v1180_v41  ;;  %v1181_v43 = vadd.f32 %v1173_v3, %v4189_v18  ;;  %v4369_v3 = vld [vmem:[%s4707_s4 + $0xe0] ss:$16 sps:$4 sm:$0xff]  }
 0x2ac   :  { %v1134_v48 = vpop.f32.mrf.mxu1  ;;  %v1175_v47 = vpop.f32.mrf.mxu0  ;;  %v4417_v41 = vld [vmem:[%s4707_s4 + $0xa0] ss:$16 sps:$4 sm:$0xff]  }
 0x2ad   :  { %3613 = vpow2.f32 %v3209_v34  ;;  %v3210_v40 = vmul.f32 -1.442695, %v1179_v44  ;;  %v4374_v34 = vld [vmem:[%s4707_s4 + $0xe8] ss:$16 sps:$4 sm:$0xff]   ;;  %v4383_v44 = vld [vmem:[%s4707_s4 + $0xc4] ss:$16 sps:$4 sm:$0xff]  }
 0x2ae   :  { %v1135_v52 = vpop.f32.mrf.mxu1  ;;  %v1176_v50 = vpop.f32.mrf.mxu0  ;;  %v4388_v48 = vld [vmem:[%s4707_s4 + $0xcc] ss:$16 sps:$4 sm:$0xff]   ;;  %v4393_v47 = vld [vmem:[%s4707_s4 + $0xc0] ss:$16 sps:$4 sm:$0xff]  }
 0x2af   :  { %3615 = vpow2.f32 %v3210_v40  ;;  %v4398_v40 = vld [vmem:[%s4707_s4 + $0xc8] ss:$16 sps:$4 sm:$0xff]   ;;  %v4407_v52 = vld [vmem:[%s4707_s4 + $0xa4] ss:$16 sps:$4 sm:$0xff]   ;;  %v4412_v50 = vld [vmem:[%s4707_s4 + $0xac] ss:$16 sps:$4 sm:$0xff]  }
 0x2b0   :  { %3617 = vpow2.f32 %v3211_v42  ;;  %v4422_v42 = vld [vmem:[%s4707_s4 + $0xa8] ss:$16 sps:$4 sm:$0xff]  }
 0x2b1   :  { %3619 = vtanh.f32 %v1181_v43  ;;  %v4431_v43 = vld [vmem:[%s4707_s4 + $0x84] ss:$16 sps:$4 sm:$0xff]  }
 0x2ba   :  { %v3614_v60 = vpop.eup %3613 }
 0x2bb   :  { %v1191_v46 = vadd.f32 1.0, %v3614_v60  ;;  %v4436_v60 = vld [vmem:[%s4707_s4 + $0x8c] ss:$16 sps:$4 sm:$0xff]  }
 0x2bc   :  { %v3616_v7 = vpop.eup %3615 }
 0x2bd   :  { %3621 = vrcp.f32 %v1191_v46  ;;  %v1192_v56 = vadd.f32 1.0, %v3616_v7  ;;  %v3618_v15 = vpop.eup %3617  ;;  %v4441_v46 = vld [vmem:[%s4707_s4 + $0x80] ss:$16 sps:$4 sm:$0xff]   ;;  %v4446_v7 = vld [vmem:[%s4707_s4 + $0x88] ss:$16 sps:$4 sm:$0xff]  }
 0x2be   :  { %v3620_v6 = vpop.eup %3619  ;;  %v1193_v63 = vadd.f32 1.0, %v3618_v15  ;;  %v4458_v15 = vld [vmem:[%s4707_s4 + $0x6c] ss:$16 sps:$4 sm:$0xff]  }
 0x2bf   :  { %3623 = vrcp.f32 %v1192_v56  ;;  %v4453_v56 = vld [vmem:[%s4707_s4 + $0x64] ss:$16 sps:$4 sm:$0xff]  }
 0x2c0   :  { %3625 = vrcp.f32 %v1193_v63  ;;  %v4489_v63 = vld [vmem:[%s4707_s4 + $0x40] ss:$16 sps:$4 sm:$0xff]  }
 0x2ca   :  { %v3622_v0 = vpop.eup %3621 }
 0x2cb   :  { %v1202_v45 = vmul.f32 %v3622_v0, %v3620_v6  ;;  %v4465_v6 = vld [vmem:[%s4707_s4 + $0x60] ss:$16 sps:$4 sm:$0xff]   ;;  %v4470_v0 = vld [vmem:[%s4707_s4 + $0x68] ss:$16 sps:$4 sm:$0xff]  }
 0x2cc   :  { %v3624_v51 = vpop.eup %3623 }
 0x2cd   :  { %v1201_v57 = vmul.f32 %v3624_v51, %v4260_v14  ;;  %v3626_v18 = vpop.eup %3625  ;;  %v4364_v14 = vld [vmem:[%s4707_s4 + $0xec] ss:$16 sps:$4 sm:$0xff]  }
 0x2ce   :  { %v4482_v51 = vld [vmem:[%s4707_s4 + $0x4c] ss:$16 sps:$4 sm:$0xff]  }
 0x2cf   :  { %v4305_v8 = vadd.f32 %v1202_v45, %v1201_v57  ;;  %v4477_v45 = vld [vmem:[%s4707_s4 + $0x44] ss:$16 sps:$4 sm:$0xff]   ;;  %v4494_v57 = vld [vmem:[%s4707_s4 + $0x48] ss:$16 sps:$4 sm:$0xff]  }
 0x2d1   :  { %3627 = vtanh.f32 %v4305_v8 }
 0x2de   :  { %v3628_v11 = vpop.eup %3627 }
 0x2df   :  { %v1205_v21 = vmul.f32 %v3628_v11, %v3626_v18  ;;  %v4506_v18 = vld [vmem:[%s4707_s4 + $0x2c] ss:$16 sps:$4 sm:$0xff]   ;;  %v4513_v11 = vld [vmem:[%s4707_s4 + $0x20] ss:$16 sps:$4 sm:$0xff]  }
 0x2e1   :  { %3212 = vst [vmem:[%s4712_s8 + $0x8] sm:$0xff] %v1205_v21  ;;  %v1215_v55 = vpack.c.bf16 %v1205_v21, %v1205_v21  ;;  %v4518_v21 = vld [vmem:[%s4707_s4 + $0x28] ss:$16 sps:$4 sm:$0xff]  }
 0x2e3   :  { %1441 = vmatmul.mubr.bf16.vlgmr.msra.gmra.mxu1 %v1215_v55  ;;  %1482 = vmatmul.mubr.bf16.vlgmr.msra.gmra.mxu0 %v1215_v55  ;;  %v4525_v55 = vld [vmem:[%s4707_s4 + $0x4] ss:$16 sps:$4 sm:$0xff]  }
 0x2e4   :  { %1721 = vmatpush1.bf16.msra.mxu1 %v3936_v53  ;;  %1762 = vmatpush1.bf16.msra.mxu0 %v3941_v54 }
 0x2e5   :  { %1722 = vmatprep.subr.bf16.mxu1 %v3948_v58  ;;  %1763 = vmatprep.subr.bf16.mxu0 %v3953_v59 }
 0x2e6   :  { %1752 = vmatprep.mubr.bf16.mxu1 %v4736_v49  ;;  %1793 = vmatprep.mubr.bf16.mxu0 %v4736_v49 }
 0x2e8   :  { %1723 = vmatpush1.bf16.msra.mxu1 %v3960_v61  ;;  %1764 = vmatpush1.bf16.msra.mxu0 %v3965_v62 }
 0x2e9   :  { %1724 = vmatprep.subr.bf16.mxu1 %v3972_v1  ;;  %1765 = vmatprep.subr.bf16.mxu0 %v3977_v2 }
 0x2ec   :  { %1725 = vmatpush1.bf16.msra.mxu1 %v3986_v4  ;;  %1766 = vmatpush1.bf16.msra.mxu0 %v3991_v5 }
 0x2ed   :  { %1726 = vmatprep.subr.bf16.mxu1 %v4000_v9  ;;  %1767 = vmatprep.subr.bf16.mxu0 %v4005_v10 }
 0x2f0   :  { %1727 = vmatpush1.bf16.msra.mxu1 %v4012_v12  ;;  %1768 = vmatpush1.bf16.msra.mxu0 %v4017_v13 }
 0x2f1   :  { %1728 = vmatprep.subr.bf16.mxu1 %v4024_v16  ;;  %1769 = vmatprep.subr.bf16.mxu0 %v4029_v17  ;;  %v4737_v16 = vld [vmem:[#allocation3_spill] sm:$0xff] }
 0x2f4   :  { %1729 = vmatpush1.bf16.msra.mxu1 %v4038_v19  ;;  %1770 = vmatpush1.bf16.msra.mxu0 %v4043_v20 }
 0x2f5   :  { %1730 = vmatprep.subr.bf16.mxu1 %v4052_v24  ;;  %1771 = vmatprep.subr.bf16.mxu0 %v4057_v25 }
 0x2f8   :  { %1731 = vmatpush1.bf16.msra.mxu1 %v4064_v26  ;;  %1772 = vmatpush1.bf16.msra.mxu0 %v4069_v27 }
 0x2f9   :  { %1732 = vmatprep.subr.bf16.mxu1 %v4076_v30  ;;  %1773 = vmatprep.subr.bf16.mxu0 %v4081_v31 }
 0x2fc   :  { %1733 = vmatpush1.bf16.msra.mxu1 %v4090_v32  ;;  %1774 = vmatpush1.bf16.msra.mxu0 %v4095_v33 }
 0x2fd   :  { %1734 = vmatprep.subr.bf16.mxu1 %v4102_v35  ;;  %1775 = vmatprep.subr.bf16.mxu0 %v4107_v36 }
 0x300   :  { %1735 = vmatpush1.bf16.msra.mxu1 %v4114_v37  ;;  %1776 = vmatpush1.bf16.msra.mxu0 %v4119_v38 }
 0x301   :  { %2073 = vmatprep.subr.bf16.mxu0 %v4364_v14 }
 0x3a3   :  { %v1442_v53 = vpop.f32.mrf.mxu1  ;;  %v1483_v54 = vpop.f32.mrf.mxu0 }
 0x3a4   :  { %v1490_v58 = vadd.f32 %v1442_v53, %v4191_v23  ;;  %v1492_v12 = vadd.f32 %v1483_v54, %v4194_v28  ;;  %v4530_v53 = vld [vmem:[%s4707_s4 + $0xc] ss:$16 sps:$4 sm:$0xff]   ;;  %v4537_v54 = vld [vmem:[%s4707_s4] ss:$16 sps:$4 sm:$0xff]  }
 0x3a5   :  { %v1444_v59 = vpop.f32.mrf.mxu1  ;;  %v1485_v61 = vpop.f32.mrf.mxu0 }
 0x3a6   :  { %v3245_v62 = vmul.f32 -1.442695, %v1490_v58  ;;  %v1491_v1 = vadd.f32 %v1444_v59, %v4196_v39  ;;  %v3247_v13 = vmul.f32 -1.442695, %v1492_v12  ;;  %v1493_v17 = vadd.f32 %v1485_v61, %v4737_v16  ;;  %v4359_v39 = vld [vmem:[%s4707_s4 + $0xe4] ss:$16 sps:$4 sm:$0xff]  }
 0x3a7   :  { %v1446_v2 = vpop.f32.mrf.mxu1  ;;  %v1487_v4 = vpop.f32.mrf.mxu0  ;;  %2032 = vmatprep.subr.bf16.mxu1 %v4359_v39  ;;  %v4542_v58 = vld [vmem:[%s4707_s4 + $0x8] ss:$16 sps:$4 sm:$0xff]  }
 0x3a8   :  { %3629 = vpow2.f32 %v3245_v62  ;;  %v3246_v5 = vmul.f32 -1.442695, %v1491_v1  ;;  %v4738_v62 = vld [vmem:[#allocation4_spill] sm:$0xff] }
 0x3a9   :  { %v1447_v9 = vpop.f32.mrf.mxu1  ;;  %v1488_v10 = vpop.f32.mrf.mxu0 }
 0x3aa   :  { %3631 = vpow2.f32 %v3246_v5  ;;  %v4739_v9 = vld [vmem:[#allocation6_spill] sm:$0xff] }
 0x3ab   :  { %3633 = vpow2.f32 %v3247_v13 }
 0x3ac   :  { %3635 = vtanh.f32 %v1493_v17 }
 0x3b5   :  { %v3630_v19 = vpop.eup %3629 }
 0x3b6   :  { %v1503_v20 = vadd.f32 1.0, %v3630_v19 }
 0x3b7   :  { %v3632_v24 = vpop.eup %3631 }
 0x3b8   :  { %3637 = vrcp.f32 %v1503_v20  ;;  %v1504_v25 = vadd.f32 1.0, %v3632_v24  ;;  %v3634_v26 = vpop.eup %3633  ;;  %v4740_v20 = vld [vmem:[#allocation5_spill] sm:$0xff] }
 0x3b9   :  { %v3636_v27 = vpop.eup %3635  ;;  %v1505_v33 = vadd.f32 1.0, %v3634_v26  ;;  %v4741_v26 = vld [vmem:[#allocation7_spill] sm:$0xff] }
 0x3ba   :  { %3639 = vrcp.f32 %v1504_v25 }
 0x3bb   :  { %3641 = vrcp.f32 %v1505_v33 }
 0x3c5   :  { %v3638_v30 = vpop.eup %3637 }
 0x3c6   :  { %v1514_v31 = vmul.f32 %v3638_v30, %v3636_v27 }
 0x3c7   :  { %v3640_v32 = vpop.eup %3639 }
 0x3c8   :  { %v1513_v35 = vmul.f32 %v3640_v32, %v4305_v8  ;;  %v3642_v37 = vpop.eup %3641  ;;  %v4501_v8 = vld [vmem:[%s4707_s4 + $0x24] ss:$16 sps:$4 sm:$0xff]  }
 0x3ca   :  { %v4348_v36 = vadd.f32 %v1514_v31, %v1513_v35 }
 0x3cc   :  { %3643 = vtanh.f32 %v4348_v36 }
 0x3d9   :  { %v3644_v38 = vpop.eup %3643 }
 0x3da   :  { %v1517_v23 = vmul.f32 %v3644_v38, %v3642_v37 }
 0x3dc   :  { %3248 = vst [vmem:[%s4712_s8 + $0x10] sm:$0xff] %v1517_v23  ;;  %v1527_v28 = vpack.c.bf16 %v1517_v23, %v1517_v23 }
 0x3de   :  { %1753 = vmatmul.mubr.bf16.vlgmr.msra.gmra.mxu1 %v1527_v28  ;;  %1794 = vmatmul.mubr.bf16.vlgmr.msra.gmra.mxu0 %v1527_v28 }
 0x3df   :  { %2064 = vmatprep.mubr.bf16.mxu1 %v4736_v49  ;;  %2105 = vmatprep.mubr.bf16.mxu0 %v4736_v49 }
 0x3e0   :  { %2033 = vmatpush1.bf16.msra.mxu1 %v4369_v3  ;;  %2074 = vmatpush1.bf16.msra.mxu0 %v4374_v34 }
 0x3e1   :  { %2034 = vmatprep.subr.bf16.mxu1 %v4383_v44  ;;  %2075 = vmatprep.subr.bf16.mxu0 %v4388_v48 }
 0x3e4   :  { %2035 = vmatpush1.bf16.msra.mxu1 %v4393_v47  ;;  %2076 = vmatpush1.bf16.msra.mxu0 %v4398_v40 }
 0x3e5   :  { %2036 = vmatprep.subr.bf16.mxu1 %v4407_v52  ;;  %2077 = vmatprep.subr.bf16.mxu0 %v4412_v50 }
 0x3e8   :  { %2037 = vmatpush1.bf16.msra.mxu1 %v4417_v41  ;;  %2078 = vmatpush1.bf16.msra.mxu0 %v4422_v42 }
 0x3e9   :  { %2038 = vmatprep.subr.bf16.mxu1 %v4431_v43  ;;  %2079 = vmatprep.subr.bf16.mxu0 %v4436_v60 }
 0x3ec   :  { %2039 = vmatpush1.bf16.msra.mxu1 %v4441_v46  ;;  %2080 = vmatpush1.bf16.msra.mxu0 %v4446_v7 }
 0x3ed   :  { %2040 = vmatprep.subr.bf16.mxu1 %v4453_v56  ;;  %2081 = vmatprep.subr.bf16.mxu0 %v4458_v15 }
 0x3f0   :  { %2041 = vmatpush1.bf16.msra.mxu1 %v4465_v6  ;;  %2082 = vmatpush1.bf16.msra.mxu0 %v4470_v0 }
 0x3f1   :  { %2042 = vmatprep.subr.bf16.mxu1 %v4477_v45  ;;  %2083 = vmatprep.subr.bf16.mxu0 %v4482_v51 }
 0x3f4   :  { %2043 = vmatpush1.bf16.msra.mxu1 %v4489_v63  ;;  %2084 = vmatpush1.bf16.msra.mxu0 %v4494_v57 }
 0x3f5   :  { %2044 = vmatprep.subr.bf16.mxu1 %v4501_v8  ;;  %2085 = vmatprep.subr.bf16.mxu0 %v4506_v18 }
 0x3f8   :  { %2045 = vmatpush1.bf16.msra.mxu1 %v4513_v11  ;;  %2086 = vmatpush1.bf16.msra.mxu0 %v4518_v21 }
 0x3f9   :  { %2046 = vmatprep.subr.bf16.mxu1 %v4525_v55  ;;  %2087 = vmatprep.subr.bf16.mxu0 %v4530_v53 }
 0x3fc   :  { %2047 = vmatpush1.bf16.msra.mxu1 %v4537_v54  ;;  %2088 = vmatpush1.bf16.msra.mxu0 %v4542_v58 }
 0x3fd   :  { %2344 = vmatprep.subr.bf16.mxu1 %v4359_v39  ;;  %2385 = vmatprep.subr.bf16.mxu0 %v4364_v14 }
 0x49e   :  { %v1754_v59 = vpop.f32.mrf.mxu1  ;;  %v1795_v61 = vpop.f32.mrf.mxu0 }
 0x49f   :  { %v1802_v1 = vadd.f32 %v1754_v59, %v4738_v62  ;;  %v1804_v24 = vadd.f32 %v1795_v61, %v4740_v20 }
 0x4a0   :  { %v1756_v2 = vpop.f32.mrf.mxu1  ;;  %v1797_v4 = vpop.f32.mrf.mxu0 }
 0x4a1   :  { %v3281_v5 = vmul.f32 -1.442695, %v1802_v1  ;;  %v1803_v10 = vadd.f32 %v1756_v2, %v4739_v9  ;;  %v3283_v25 = vmul.f32 -1.442695, %v1804_v24  ;;  %v1805_v27 = vadd.f32 %v1797_v4, %v4741_v26 }
 0x4a2   :  { %v1758_v12 = vpop.f32.mrf.mxu1  ;;  %v1799_v13 = vpop.f32.mrf.mxu0 }
 0x4a3   :  { %3645 = vpow2.f32 %v3281_v5  ;;  %v3282_v16 = vmul.f32 -1.442695, %v1803_v10  ;;  %v4742_v10 = vld [vmem:[#allocation8_spill] sm:$0xff] }
 0x4a4   :  { %v1759_v17 = vpop.f32.mrf.mxu1  ;;  %v1800_v19 = vpop.f32.mrf.mxu0 }
 0x4a5   :  { %3647 = vpow2.f32 %v3282_v16  ;;  %v4743_v19 = vld [vmem:[#allocation10_spill] sm:$0xff] }
 0x4a6   :  { %3649 = vpow2.f32 %v3283_v25 }
 0x4a7   :  { %3651 = vtanh.f32 %v1805_v27 }
 0x4b0   :  { %v3646_v30 = vpop.eup %3645 }
 0x4b1   :  { %v1815_v31 = vadd.f32 1.0, %v3646_v30 }
 0x4b2   :  { %v3648_v32 = vpop.eup %3647 }
 0x4b3   :  { %3653 = vrcp.f32 %v1815_v31  ;;  %v1816_v33 = vadd.f32 1.0, %v3648_v32  ;;  %v3650_v35 = vpop.eup %3649  ;;  %v4744_v31 = vld [vmem:[#allocation9_spill] sm:$0xff] }
 0x4b4   :  { %v3652_v37 = vpop.eup %3651  ;;  %v1817_v59 = vadd.f32 1.0, %v3650_v35  ;;  %v4745_v35 = vld [vmem:[#allocation11_spill] sm:$0xff] }
 0x4b5   :  { %3655 = vrcp.f32 %v1816_v33 }
 0x4b6   :  { %3657 = vrcp.f32 %v1817_v59 }
 0x4c0   :  { %v3654_v38 = vpop.eup %3653 }
 0x4c1   :  { %v1826_v23 = vmul.f32 %v3654_v38, %v3652_v37 }
 0x4c2   :  { %v3656_v28 = vpop.eup %3655 }
 0x4c3   :  { %v1825_v62 = vmul.f32 %v3656_v28, %v4348_v36  ;;  %v3658_v1 = vpop.eup %3657 }
 0x4c5   :  { %v4555_v61 = vadd.f32 %v1826_v23, %v1825_v62 }
 0x4c7   :  { %3659 = vtanh.f32 %v4555_v61 }
 0x4d4   :  { %v3660_v2 = vpop.eup %3659 }
 0x4d5   :  { %v1829_v4 = vmul.f32 %v3660_v2, %v3658_v1 }
 0x4d7   :  { %3284 = vst [vmem:[%s4712_s8 + $0x18] sm:$0xff] %v1829_v4  ;;  %v1839_v5 = vpack.c.bf16 %v1829_v4, %v1829_v4 }
 0x4d9   :  { %2065 = vmatmul.mubr.bf16.vlgmr.msra.gmra.mxu1 %v1839_v5  ;;  %2106 = vmatmul.mubr.bf16.vlgmr.msra.gmra.mxu0 %v1839_v5 }
 0x4da   :  { %2345 = vmatpush1.bf16.msra.mxu1 %v4369_v3  ;;  %2386 = vmatpush1.bf16.msra.mxu0 %v4374_v34 }
 0x4db   :  { %2346 = vmatprep.subr.bf16.mxu1 %v4383_v44  ;;  %2387 = vmatprep.subr.bf16.mxu0 %v4388_v48 }
 0x4dc   :  { %2376 = vmatprep.mubr.bf16.mxu1 %v4736_v49  ;;  %2417 = vmatprep.mubr.bf16.mxu0 %v4736_v49 }
 0x4de   :  { %2347 = vmatpush1.bf16.msra.mxu1 %v4393_v47  ;;  %2388 = vmatpush1.bf16.msra.mxu0 %v4398_v40 }
 0x4df   :  { %2348 = vmatprep.subr.bf16.mxu1 %v4407_v52  ;;  %2389 = vmatprep.subr.bf16.mxu0 %v4412_v50 }
 0x4e2   :  { %2349 = vmatpush1.bf16.msra.mxu1 %v4417_v41  ;;  %2390 = vmatpush1.bf16.msra.mxu0 %v4422_v42 }
 0x4e3   :  { %2350 = vmatprep.subr.bf16.mxu1 %v4431_v43  ;;  %2391 = vmatprep.subr.bf16.mxu0 %v4436_v60 }
 0x4e6   :  { %2351 = vmatpush1.bf16.msra.mxu1 %v4441_v46  ;;  %2392 = vmatpush1.bf16.msra.mxu0 %v4446_v7 }
 0x4e7   :  { %2352 = vmatprep.subr.bf16.mxu1 %v4453_v56  ;;  %2393 = vmatprep.subr.bf16.mxu0 %v4458_v15 }
 0x4ea   :  { %2353 = vmatpush1.bf16.msra.mxu1 %v4465_v6  ;;  %2394 = vmatpush1.bf16.msra.mxu0 %v4470_v0 }
 0x4eb   :  { %2354 = vmatprep.subr.bf16.mxu1 %v4477_v45  ;;  %2395 = vmatprep.subr.bf16.mxu0 %v4482_v51 }
 0x4ee   :  { %2355 = vmatpush1.bf16.msra.mxu1 %v4489_v63  ;;  %2396 = vmatpush1.bf16.msra.mxu0 %v4494_v57 }
 0x4ef   :  { %2356 = vmatprep.subr.bf16.mxu1 %v4501_v8  ;;  %2397 = vmatprep.subr.bf16.mxu0 %v4506_v18 }
 0x4f2   :  { %2357 = vmatpush1.bf16.msra.mxu1 %v4513_v11  ;;  %2398 = vmatpush1.bf16.msra.mxu0 %v4518_v21 }
 0x4f3   :  { %2358 = vmatprep.subr.bf16.mxu1 %v4525_v55  ;;  %2399 = vmatprep.subr.bf16.mxu0 %v4530_v53 }
 0x4f6   :  { %2359 = vmatpush1.bf16.msra.mxu1 %v4537_v54  ;;  %2400 = vmatpush1.bf16.msra.mxu0 %v4542_v58 }
 0x4f7   :  { %2656 = vmatprep.subr.bf16.mxu1 %v4359_v39  ;;  %2697 = vmatprep.subr.bf16.mxu0 %v4364_v14 }
 0x599   :  { %v2066_v36 = vpop.f32.mrf.mxu1  ;;  %v2107_v9 = vpop.f32.mrf.mxu0 }
 0x59a   :  { %v2114_v12 = vadd.f32 %v2066_v36, %v4742_v10  ;;  %v2116_v32 = vadd.f32 %v2107_v9, %v4744_v31 }
 0x59b   :  { %v2068_v13 = vpop.f32.mrf.mxu1  ;;  %v2109_v16 = vpop.f32.mrf.mxu0 }
 0x59c   :  { %v3317_v17 = vmul.f32 -1.442695, %v2114_v12  ;;  %v2115_v20 = vadd.f32 %v2068_v13, %v4743_v19  ;;  %v3319_v33 = vmul.f32 -1.442695, %v2116_v32  ;;  %v2117_v37 = vadd.f32 %v2109_v16, %v4745_v35 }
 0x59d   :  { %v2070_v24 = vpop.f32.mrf.mxu1  ;;  %v2111_v25 = vpop.f32.mrf.mxu0 }
 0x59e   :  { %3661 = vpow2.f32 %v3317_v17  ;;  %v3318_v26 = vmul.f32 -1.442695, %v2115_v20  ;;  %v4746_v20 = vld [vmem:[#allocation12_spill] sm:$0xff] }
 0x59f   :  { %v2071_v27 = vpop.f32.mrf.mxu1  ;;  %v2112_v30 = vpop.f32.mrf.mxu0 }
 0x5a0   :  { %3663 = vpow2.f32 %v3318_v26  ;;  %v4747_v30 = vld [vmem:[#allocation14_spill] sm:$0xff] }
 0x5a1   :  { %3665 = vpow2.f32 %v3319_v33 }
 0x5a2   :  { %3667 = vtanh.f32 %v2117_v37 }
 0x5ab   :  { %v3662_v38 = vpop.eup %3661 }
 0x5ac   :  { %v2127_v23 = vadd.f32 1.0, %v3662_v38 }
 0x5ad   :  { %v3664_v28 = vpop.eup %3663 }
 0x5ae   :  { %3669 = vrcp.f32 %v2127_v23  ;;  %v2128_v59 = vadd.f32 1.0, %v3664_v28  ;;  %v3666_v62 = vpop.eup %3665  ;;  %v4748_v23 = vld [vmem:[#allocation13_spill] sm:$0xff] }
 0x5af   :  { %v3668_v1 = vpop.eup %3667  ;;  %v2129_v36 = vadd.f32 1.0, %v3666_v62 }
 0x5b0   :  { %3671 = vrcp.f32 %v2128_v59 }
 0x5b1   :  { %3673 = vrcp.f32 %v2129_v36 }
 0x5bb   :  { %v3670_v2 = vpop.eup %3669 }
 0x5bc   :  { %v2138_v4 = vmul.f32 %v3670_v2, %v3668_v1 }
 0x5bd   :  { %v3672_v5 = vpop.eup %3671 }
 0x5be   :  { %v2137_v10 = vmul.f32 %v3672_v5, %v4555_v61  ;;  %v3674_v12 = vpop.eup %3673 }
 0x5c0   :  { %v4600_v9 = vadd.f32 %v2138_v4, %v2137_v10 }
 0x5c2   :  { %3675 = vtanh.f32 %v4600_v9 }
 0x5cf   :  { %v3676_v13 = vpop.eup %3675 }
 0x5d0   :  { %v2141_v16 = vmul.f32 %v3676_v13, %v3674_v12 }
 0x5d2   :  { %3320 = vst [vmem:[%s4712_s8 + $0x20] sm:$0xff] %v2141_v16  ;;  %v2151_v17 = vpack.c.bf16 %v2141_v16, %v2141_v16 }
 0x5d4   :  { %2377 = vmatmul.mubr.bf16.vlgmr.msra.gmra.mxu1 %v2151_v17  ;;  %2418 = vmatmul.mubr.bf16.vlgmr.msra.gmra.mxu0 %v2151_v17 }
 0x5d5   :  { %2657 = vmatpush1.bf16.msra.mxu1 %v4369_v3  ;;  %2698 = vmatpush1.bf16.msra.mxu0 %v4374_v34 }
 0x5d6   :  { %2658 = vmatprep.subr.bf16.mxu1 %v4383_v44  ;;  %2699 = vmatprep.subr.bf16.mxu0 %v4388_v48 }
 0x5d7   :  { %2688 = vmatprep.mubr.bf16.mxu1 %v4736_v49  ;;  %2729 = vmatprep.mubr.bf16.mxu0 %v4736_v49 }
 0x5d9   :  { %2659 = vmatpush1.bf16.msra.mxu1 %v4393_v47  ;;  %2700 = vmatpush1.bf16.msra.mxu0 %v4398_v40 }
 0x5da   :  { %2660 = vmatprep.subr.bf16.mxu1 %v4407_v52  ;;  %2701 = vmatprep.subr.bf16.mxu0 %v4412_v50 }
 0x5dd   :  { %2661 = vmatpush1.bf16.msra.mxu1 %v4417_v41  ;;  %2702 = vmatpush1.bf16.msra.mxu0 %v4422_v42 }
 0x5de   :  { %2662 = vmatprep.subr.bf16.mxu1 %v4431_v43  ;;  %2703 = vmatprep.subr.bf16.mxu0 %v4436_v60 }
 0x5e1   :  { %2663 = vmatpush1.bf16.msra.mxu1 %v4441_v46  ;;  %2704 = vmatpush1.bf16.msra.mxu0 %v4446_v7 }
 0x5e2   :  { %2664 = vmatprep.subr.bf16.mxu1 %v4453_v56  ;;  %2705 = vmatprep.subr.bf16.mxu0 %v4458_v15 }
 0x5e5   :  { %2665 = vmatpush1.bf16.msra.mxu1 %v4465_v6  ;;  %2706 = vmatpush1.bf16.msra.mxu0 %v4470_v0 }
 0x5e6   :  { %2666 = vmatprep.subr.bf16.mxu1 %v4477_v45  ;;  %2707 = vmatprep.subr.bf16.mxu0 %v4482_v51 }
 0x5e9   :  { %2667 = vmatpush1.bf16.msra.mxu1 %v4489_v63  ;;  %2708 = vmatpush1.bf16.msra.mxu0 %v4494_v57 }
 0x5ea   :  { %2668 = vmatprep.subr.bf16.mxu1 %v4501_v8  ;;  %2709 = vmatprep.subr.bf16.mxu0 %v4506_v18 }
 0x5ed   :  { %2669 = vmatpush1.bf16.msra.mxu1 %v4513_v11  ;;  %2710 = vmatpush1.bf16.msra.mxu0 %v4518_v21 }
 0x5ee   :  { %2670 = vmatprep.subr.bf16.mxu1 %v4525_v55  ;;  %2711 = vmatprep.subr.bf16.mxu0 %v4530_v53 }
 0x5f1   :  { %2671 = vmatpush1.bf16.msra.mxu1 %v4537_v54  ;;  %2712 = vmatpush1.bf16.msra.mxu0 %v4542_v58 }
 0x5f2   :  { %2968 = vmatprep.subr.bf16.mxu1 %v4359_v39  ;;  %3009 = vmatprep.subr.bf16.mxu0 %v4364_v14  ;;  %v4749_v14 = vld [vmem:[#allocation15_spill] sm:$0xff] }
 0x694   :  { %v2378_v61 = vpop.f32.mrf.mxu1  ;;  %v2419_v19 = vpop.f32.mrf.mxu0 }
 0x695   :  { %v2426_v24 = vadd.f32 %v2378_v61, %v4746_v20  ;;  %v2428_v39 = vadd.f32 %v2419_v19, %v4748_v23 }
 0x696   :  { %v2380_v25 = vpop.f32.mrf.mxu1  ;;  %v2421_v26 = vpop.f32.mrf.mxu0 }
 0x697   :  { %v3353_v27 = vmul.f32 -1.442695, %v2426_v24  ;;  %v2427_v31 = vadd.f32 %v2380_v25, %v4747_v30  ;;  %v3355_v28 = vmul.f32 -1.442695, %v2428_v39  ;;  %v2429_v59 = vadd.f32 %v2421_v26, %v4749_v14 }
 0x698   :  { %v2382_v32 = vpop.f32.mrf.mxu1  ;;  %v2423_v33 = vpop.f32.mrf.mxu0 }
 0x699   :  { %3677 = vpow2.f32 %v3353_v27  ;;  %v3354_v35 = vmul.f32 -1.442695, %v2427_v31  ;;  %v4754_v33 = vld [vmem:[#allocation20_spill] sm:$0xff] }
 0x69a   :  { %v2383_v37 = vpop.f32.mrf.mxu1  ;;  %v2424_v38 = vpop.f32.mrf.mxu0 }
 0x69b   :  { %3679 = vpow2.f32 %v3354_v35 }
 0x69c   :  { %3681 = vpow2.f32 %v3355_v28 }
 0x69d   :  { %3683 = vtanh.f32 %v2429_v59 }
 0x6a6   :  { %v3678_v62 = vpop.eup %3677 }
 0x6a7   :  { %v2439_v1 = vadd.f32 1.0, %v3678_v62 }
 0x6a8   :  { %v3680_v2 = vpop.eup %3679 }
 0x6a9   :  { %3685 = vrcp.f32 %v2439_v1  ;;  %v2440_v4 = vadd.f32 1.0, %v3680_v2  ;;  %v3682_v5 = vpop.eup %3681  ;;  %v4755_v2 = vld [vmem:[#allocation21_spill] sm:$0xff] }
 0x6aa   :  { %v3684_v36 = vpop.eup %3683  ;;  %v2441_v16 = vadd.f32 1.0, %v3682_v5 }
 0x6ab   :  { %3687 = vrcp.f32 %v2440_v4 }
 0x6ac   :  { %3689 = vrcp.f32 %v2441_v16 }
 0x6b6   :  { %v3686_v10 = vpop.eup %3685 }
 0x6b7   :  { %v2450_v12 = vmul.f32 %v3686_v10, %v3684_v36 }
 0x6b8   :  { %v3688_v13 = vpop.eup %3687 }
 0x6b9   :  { %v2449_v17 = vmul.f32 %v3688_v13, %v4600_v9  ;;  %v3690_v19 = vpop.eup %3689 }
 0x6bb   :  { %v4645_v61 = vadd.f32 %v2450_v12, %v2449_v17 }
 0x6bd   :  { %3691 = vtanh.f32 %v4645_v61 }
 0x6ca   :  { %v3692_v20 = vpop.eup %3691 }
 0x6cb   :  { %v2453_v24 = vmul.f32 %v3692_v20, %v3690_v19 }
 0x6cd   :  { %3356 = vst [vmem:[%s4712_s8 + $0x28] sm:$0xff] %v2453_v24  ;;  %v2463_v25 = vpack.c.bf16 %v2453_v24, %v2453_v24 }
 0x6cf   :  { %2689 = vmatmul.mubr.bf16.vlgmr.msra.gmra.mxu1 %v2463_v25  ;;  %2730 = vmatmul.mubr.bf16.vlgmr.msra.gmra.mxu0 %v2463_v25 }
 0x6d0   :  { %2969 = vmatpush1.bf16.msra.mxu1 %v4369_v3  ;;  %3010 = vmatpush1.bf16.msra.mxu0 %v4374_v34  ;;  %v4750_v34 = vld [vmem:[#allocation16_spill] sm:$0xff] }
 0x6d1   :  { %2970 = vmatprep.subr.bf16.mxu1 %v4383_v44  ;;  %3011 = vmatprep.subr.bf16.mxu0 %v4388_v48 }
 0x6d2   :  { %3000 = vmatprep.mubr.bf16.mxu1 %v4736_v49  ;;  %3041 = vmatprep.mubr.bf16.mxu0 %v4736_v49 }
 0x6d4   :  { %2971 = vmatpush1.bf16.msra.mxu1 %v4393_v47  ;;  %3012 = vmatpush1.bf16.msra.mxu0 %v4398_v40 }
 0x6d5   :  { %2972 = vmatprep.subr.bf16.mxu1 %v4407_v52  ;;  %3013 = vmatprep.subr.bf16.mxu0 %v4412_v50  ;;  %v4751_v52 = vld [vmem:[#allocation18_spill] sm:$0xff] }
 0x6d8   :  { %2973 = vmatpush1.bf16.msra.mxu1 %v4417_v41  ;;  %3014 = vmatpush1.bf16.msra.mxu0 %v4422_v42 }
 0x6d9   :  { %2974 = vmatprep.subr.bf16.mxu1 %v4431_v43  ;;  %3015 = vmatprep.subr.bf16.mxu0 %v4436_v60 }
 0x6dc   :  { %2975 = vmatpush1.bf16.msra.mxu1 %v4441_v46  ;;  %3016 = vmatpush1.bf16.msra.mxu0 %v4446_v7  ;;  %v4752_v7 = vld [vmem:[#allocation17_spill] sm:$0xff] }
 0x6dd   :  { %2976 = vmatprep.subr.bf16.mxu1 %v4453_v56  ;;  %3017 = vmatprep.subr.bf16.mxu0 %v4458_v15 }
 0x6e0   :  { %2977 = vmatpush1.bf16.msra.mxu1 %v4465_v6  ;;  %3018 = vmatpush1.bf16.msra.mxu0 %v4470_v0  ;;  %v4753_v6 = vld [vmem:[#allocation19_spill] sm:$0xff] }
 0x6e1   :  { %2978 = vmatprep.subr.bf16.mxu1 %v4477_v45  ;;  %3019 = vmatprep.subr.bf16.mxu0 %v4482_v51 }
 0x6e4   :  { %2979 = vmatpush1.bf16.msra.mxu1 %v4489_v63  ;;  %3020 = vmatpush1.bf16.msra.mxu0 %v4494_v57 }
 0x6e5   :  { %2980 = vmatprep.subr.bf16.mxu1 %v4501_v8  ;;  %3021 = vmatprep.subr.bf16.mxu0 %v4506_v18 }
 0x6e8   :  { %2981 = vmatpush1.bf16.msra.mxu1 %v4513_v11  ;;  %3022 = vmatpush1.bf16.msra.mxu0 %v4518_v21 }
 0x6e9   :  { %2982 = vmatprep.subr.bf16.mxu1 %v4525_v55  ;;  %3023 = vmatprep.subr.bf16.mxu0 %v4530_v53 }
 0x6ec   :  { %2983 = vmatpush1.bf16.msra.mxu1 %v4537_v54  ;;  %3024 = vmatpush1.bf16.msra.mxu0 %v4542_v58 }
 0x78f   :  { %v2690_v49 = vpop.f32.mrf.mxu1  ;;  %v2731_v3 = vpop.f32.mrf.mxu0 }
 0x790   :  { %v2738_v44 = vadd.f32 %v2690_v49, %v4750_v34  ;;  %v2740_v56 = vadd.f32 %v2731_v3, %v4752_v7 }
 0x791   :  { %v2692_v48 = vpop.f32.mrf.mxu1  ;;  %v2733_v47 = vpop.f32.mrf.mxu0 }
 0x792   :  { %v3389_v40 = vmul.f32 -1.442695, %v2738_v44  ;;  %v2739_v50 = vadd.f32 %v2692_v48, %v4751_v52  ;;  %v3391_v15 = vmul.f32 -1.442695, %v2740_v56  ;;  %v2741_v0 = vadd.f32 %v2733_v47, %v4753_v6 }
 0x793   :  { %v2694_v41 = vpop.f32.mrf.mxu1  ;;  %v2735_v42 = vpop.f32.mrf.mxu0 }
 0x794   :  { %3693 = vpow2.f32 %v3389_v40  ;;  %v3390_v43 = vmul.f32 -1.442695, %v2739_v50 }
 0x795   :  { %v2695_v60 = vpop.f32.mrf.mxu1  ;;  %v2736_v46 = vpop.f32.mrf.mxu0 }
 0x796   :  { %3695 = vpow2.f32 %v3390_v43 }
 0x797   :  { %3697 = vpow2.f32 %v3391_v15 }
 0x798   :  { %3699 = vtanh.f32 %v2741_v0 }
 0x7a1   :  { %v3694_v45 = vpop.eup %3693 }
 0x7a2   :  { %v2751_v51 = vadd.f32 1.0, %v3694_v45 }
 0x7a3   :  { %v3696_v63 = vpop.eup %3695 }
 0x7a4   :  { %3701 = vrcp.f32 %v2751_v51  ;;  %v2752_v57 = vadd.f32 1.0, %v3696_v63  ;;  %v3698_v8 = vpop.eup %3697 }
 0x7a5   :  { %v3700_v18 = vpop.eup %3699  ;;  %v2753_v53 = vadd.f32 1.0, %v3698_v8 }
 0x7a6   :  { %3703 = vrcp.f32 %v2752_v57 }
 0x7a7   :  { %3705 = vrcp.f32 %v2753_v53 }
 0x7b1   :  { %v3702_v11 = vpop.eup %3701 }
 0x7b2   :  { %v2762_v21 = vmul.f32 %v3702_v11, %v3700_v18 }
 0x7b3   :  { %v3704_v55 = vpop.eup %3703 }
 0x7b4   :  { %v2761_v54 = vmul.f32 %v3704_v55, %v4645_v61  ;;  %v3706_v9 = vpop.eup %3705 }
 0x7b6   :  { %v2763_v58 = vadd.f32 %v2762_v21, %v2761_v54 }
 0x7b8   :  { %3707 = vtanh.f32 %v2763_v58 }
 0x7c5   :  { %v3708_v26 = vpop.eup %3707 }
 0x7c6   :  { %v2765_v27 = vmul.f32 %v3708_v26, %v3706_v9 }
 0x7c8   :  { %3392 = vst [vmem:[%s4712_s8 + $0x30] sm:$0xff] %v2765_v27  ;;  %v2775_v30 = vpack.c.bf16 %v2765_v27, %v2765_v27 }
 0x7ca   :  { %3001 = vmatmul.mubr.bf16.vlgmr.msra.gmra.mxu1 %v2775_v30  ;;  %3042 = vmatmul.mubr.bf16.vlgmr.msra.gmra.mxu0 %v2775_v30 }
 0x88a   :  { %v3002_v31 = vpop.f32.mrf.mxu1  ;;  %v3043_v32 = vpop.f32.mrf.mxu0 }
 0x88b   :  { %v3050_v35 = vadd.f32 %v3002_v31, %v4754_v33  ;;  %v3052_v4 = vadd.f32 %v3043_v32, %v4755_v2 }
 0x88c   :  { %v3004_v37 = vpop.f32.mrf.mxu1  ;;  %v3045_v38 = vpop.f32.mrf.mxu0 }
 0x88d   :  { %v3425_v23 = vmul.f32 -1.442695, %v3050_v35  ;;  %v3051_v39 = vadd.f32 %v3004_v37, %v4247_v22  ;;  %v3427_v5 = vmul.f32 -1.442695, %v3052_v4  ;;  %v3053_v36 = vadd.f32 %v3045_v38, %v4250_v29 }
 0x88e   :  { %v3006_v28 = vpop.f32.mrf.mxu1  ;;  %v3047_v14 = vpop.f32.mrf.mxu0 }
 0x88f   :  { %3709 = vpow2.f32 %v3425_v23  ;;  %v3426_v59 = vmul.f32 -1.442695, %v3051_v39 }
 0x890   :  { %v3007_v62 = vpop.f32.mrf.mxu1  ;;  %v3048_v1 = vpop.f32.mrf.mxu0 }
 0x891   :  { %3711 = vpow2.f32 %v3426_v59 }
 0x892   :  { %3713 = vpow2.f32 %v3427_v5 }
 0x893   :  { %3715 = vtanh.f32 %v3053_v36 }
 0x89c   :  { %v3710_v10 = vpop.eup %3709 }
 0x89d   :  { %v3063_v12 = vadd.f32 1.0, %v3710_v10 }
 0x89e   :  { %v3712_v13 = vpop.eup %3711 }
 0x89f   :  { %3717 = vrcp.f32 %v3063_v12  ;;  %v3064_v16 = vadd.f32 1.0, %v3712_v13  ;;  %v3714_v22 = vpop.eup %3713 }
 0x8a0   :  { %v3716_v17 = vpop.eup %3715  ;;  %v3065_v24 = vadd.f32 1.0, %v3714_v22 }
 0x8a1   :  { %3719 = vrcp.f32 %v3064_v16 }
 0x8a2   :  { %3721 = vrcp.f32 %v3065_v24 }
 0x8ac   :  { %v3718_v61 = vpop.eup %3717 }
 0x8ad   :  { %v3074_v19 = vmul.f32 %v3718_v61, %v3716_v17 }
 0x8ae   :  { %v3720_v20 = vpop.eup %3719 }
 0x8af   :  { %v3073_v25 = vmul.f32 %v3720_v20, %v2763_v58  ;;  %v3722_v29 = vpop.eup %3721 }
 0x8b1   :  { %v3075_v49 = vadd.f32 %v3074_v19, %v3073_v25 }
 0x8b3   :  { %3723 = vtanh.f32 %v3075_v49  ;;  %3081 = vst [vmem:[%s4713_s10] sm:$0xff] %v3075_v49 }
 0x8c0   :  { %v3724_v3 = vpop.eup %3723 }
 0x8c1   :  { %v3077_v34 = vmul.f32 %v3724_v3, %v3722_v29 }
 0x8c3   :  { %3428 = vst [vmem:[%s4712_s8 + $0x38] sm:$0xff] %v3077_v34  ;;  %3080 = vst [vmem:[%s4714_s9] sm:$0xff] %v3077_v34 }

</bundles_post_ra>
